<compile_context>
chip_gen: v7x
topology: tpu7x:2x2x1
jax: 0.10.0
libtpu: 0.0.40
codegen_flags: <defaults>
</compile_context>

<pallas_src>
import functools

import jax
import jax.numpy as jnp
from jax import lax
from jax.experimental import pallas as pl
from jax.experimental.pallas import tpu as pltpu


def _lstm_recurrence_kernel(gx_ref, w_hh_ref, w_lin_ref, b_lin_ref, out_ref):
    """Serial LSTM recurrence + final linear, single invocation (no grid).

    gx_ref:    (T, 4, B, H) f32  precomputed x_t @ W_ih^T + (b_ih + b_hh), gate-major,
                                 PyTorch gate order [i, f, g, o].
    w_hh_ref:  (4, H, H)   f32   per-gate recurrent weights, w_hh_ref[g] = W_hh_g^T.
    w_lin_ref: (H, O_pad)  f32   final linear weight, lane-padded to 128.
    b_lin_ref: (1, O_pad)  f32   final linear bias, lane-padded.
    out_ref:   (B, O_pad)  f32.
    """
    T, _, B, H = gx_ref.shape

    # Loop-invariant recurrent weights: load once via leading-dim indexing (no lane work).
    w_i = w_hh_ref[0]
    w_f = w_hh_ref[1]
    w_g = w_hh_ref[2]
    w_o = w_hh_ref[3]

    def step(t, carry):
        h, c = carry
        gt = gx_ref[t]                                  # (4, B, H) pre-activations for step t
        pre_i = gt[0] + jnp.dot(h, w_i, preferred_element_type=jnp.float32)
        pre_f = gt[1] + jnp.dot(h, w_f, preferred_element_type=jnp.float32)
        pre_g = gt[2] + jnp.dot(h, w_g, preferred_element_type=jnp.float32)
        pre_o = gt[3] + jnp.dot(h, w_o, preferred_element_type=jnp.float32)
        i_g = jax.nn.sigmoid(pre_i)                     # EUP
        f_g = jax.nn.sigmoid(pre_f)
        g_g = jnp.tanh(pre_g)
        o_g = jax.nn.sigmoid(pre_o)
        c_new = f_g * c + i_g * g_g                     # VPU
        h_new = o_g * jnp.tanh(c_new)
        return h_new, c_new

    h0 = jnp.zeros((B, H), jnp.float32)
    c0 = jnp.zeros((B, H), jnp.float32)
    # T is static (8): fully unroll so the LLO scheduler sees the whole recurrence.
    h_last, _ = lax.fori_loop(0, T, step, (h0, c0), unroll=True)

    # Final Linear on the last hidden state; lane-dense (O_pad = 128) store.
    out_ref[...] = (jnp.dot(h_last, w_lin_ref[...],
                            preferred_element_type=jnp.float32)
                    + b_lin_ref[...])


def prepare_lstm_params(params):
    """One-time parameter preprocessing, hoisted out of the per-call forward path."""
    H = params["w_hh"].shape[1]
    O = params["w_lin"].shape[0]
    O_pad = max(128, ((O + 127) // 128) * 128)
    return {
        # padding_idx=0 -> zero embedding row (done once, not a per-forward table copy).
        "emb": params["embedding"].at[0].set(0.0),                        # (V, E)
        "w_ih_t": params["w_ih"].T,                                       # (E, 4H)
        "b": params["b_ih"] + params["b_hh"],                             # (4H,)
        # Per-gate recurrent weights: [g] = W_hh_g^T, PyTorch gate order [i, f, g, o].
        "w_hh_g": params["w_hh"].reshape(4, H, H).transpose(0, 2, 1),     # (4, H, H)
        # Lane-padded final linear so the kernel's single output store is unmasked.
        "w_lin_pad": jnp.zeros((H, O_pad), jnp.float32).at[:, :O].set(params["w_lin"].T),
        "b_lin_pad": jnp.zeros((1, O_pad), jnp.float32).at[:, :O].set(params["b_lin"][None, :]),
    }


@functools.partial(jax.jit, static_argnames=("out_dim",))
def lstm_module_forward(text, prep, *, out_dim):
    """Full module forward: embedding (padding_idx=0) -> dropout(identity) -> LSTM -> linear."""
    B, T = text.shape
    H = prep["w_hh_g"].shape[1]
    O_pad = prep["w_lin_pad"].shape[1]

    # Front-end glue in plain JAX: gather + ONE batched input projection for all timesteps
    # (hoisted off the serial critical path), then reshape to time- & gate-major.
    x = prep["emb"][text.reshape(-1)]                     # (B*T, E) gather
    gx = x @ prep["w_ih_t"] + prep["b"]                   # (B*T, 4H) single matmul
    gx = gx.reshape(B, T, 4, H).transpose(1, 2, 0, 3)     # (T, 4, B, H)

    out_pad = pl.pallas_call(
        _lstm_recurrence_kernel,
        out_shape=jax.ShapeDtypeStruct((B, O_pad), jnp.float32),
        in_specs=[
            pl.BlockSpec(memory_space=pltpu.MemorySpace.VMEM),   # gx (whole slab, loaded once)
            pl.BlockSpec(memory_space=pltpu.MemorySpace.VMEM),   # w_hh_g
            pl.BlockSpec(memory_space=pltpu.MemorySpace.VMEM),   # w_lin_pad
            pl.BlockSpec(memory_space=pltpu.MemorySpace.VMEM),   # b_lin_pad
        ],
        out_specs=pl.BlockSpec(memory_space=pltpu.MemorySpace.VMEM),
    )(gx, prep["w_hh_g"], prep["w_lin_pad"], prep["b_lin_pad"])

    return out_pad[:, :out_dim]


def reference_forward(text, params):
    """Pure-JAX reference matching PyTorch nn.LSTM semantics (eval mode)."""
    emb_table = params["embedding"].at[0].set(0.0)
    x = emb_table[text]                              # (B, T, E)
    B, T, E = x.shape
    H = params["w_hh"].shape[1]
    h = jnp.zeros((B, H), jnp.float32)
    c = jnp.zeros((B, H), jnp.float32)
    w_ih_t = params["w_ih"].T
    w_hh_t = params["w_hh"].T
    b = params["b_ih"] + params["b_hh"]
    for t in range(T):
        gates = x[:, t, :] @ w_ih_t + h @ w_hh_t + b
        i = jax.nn.sigmoid(gates[:, :H])
        f = jax.nn.sigmoid(gates[:, H:2 * H])
        g = jnp.tanh(gates[:, 2 * H:3 * H])
        o = jax.nn.sigmoid(gates[:, 3 * H:])
        c = f * c + i * g
        h = o * jnp.tanh(c)
    return h @ params["w_lin"].T + params["b_lin"]


if __name__ == "__main__":
    vocab_size = 100
    embedding_dim = 256
    hidden_dim = 32
    output_dim = 4
    batch = 2
    seq_len = 8

    key = jax.random.PRNGKey(0)
    k_emb, k_wih, k_whh, k_bih, k_bhh, k_wl, k_bl, k_txt = jax.random.split(key, 8)

    params = {
        "embedding": jax.random.normal(k_emb, (vocab_size, embedding_dim), jnp.float32) * 0.1,
        "w_ih": jax.random.normal(k_wih, (4 * hidden_dim, embedding_dim), jnp.float32) * 0.1,
        "w_hh": jax.random.normal(k_whh, (4 * hidden_dim, hidden_dim), jnp.float32) * 0.1,
        "b_ih": jax.random.normal(k_bih, (4 * hidden_dim,), jnp.float32) * 0.1,
        "b_hh": jax.random.normal(k_bhh, (4 * hidden_dim,), jnp.float32) * 0.1,
        "w_lin": jax.random.normal(k_wl, (output_dim, hidden_dim), jnp.float32) * 0.1,
        "b_lin": jax.random.normal(k_bl, (output_dim,), jnp.float32) * 0.1,
    }

    text = jax.random.randint(k_txt, (batch, seq_len), 0, vocab_size, dtype=jnp.int32)

    prep = prepare_lstm_params(params)
    out = jax.block_until_ready(lstm_module_forward(text, prep, out_dim=output_dim))

    ref = reference_forward(text, params)
    assert out.shape == (batch, output_dim)
    assert jnp.allclose(out, ref, atol=1e-4, rtol=1e-4), (out, ref)

    print("KERNEL_OK")
</pallas_src>

<mosaic_0001>
module attributes {stable_mosaic.version = 11 : i64} {
  func.func @_lstm_recurrence_kernel(%arg0: memref<8x4x2x32xf32, #tpu.memory_space<vmem>>, %arg1: memref<4x32x32xf32, #tpu.memory_space<vmem>>, %arg2: memref<32x128xf32, #tpu.memory_space<vmem>>, %arg3: memref<1x128xf32, #tpu.memory_space<vmem>>, %arg4: memref<2x128xf32, #tpu.memory_space<vmem>>) attributes {dimension_semantics = [], scalar_prefetch = 0 : i64, scratch_operands = 0 : i64, tpu.core_type = #tpu.core_type<tc>} {
    %c0 = arith.constant 0 : index
    %c0_0 = arith.constant 0 : index
    %c0_1 = arith.constant 0 : index
    %0 = vector.load %arg1[%c0, %c0_0, %c0_1] : memref<4x32x32xf32, #tpu.memory_space<vmem>>, vector<1x32x32xf32>
    %1 = vector.shape_cast %0 : vector<1x32x32xf32> to vector<32x32xf32>
    %c1 = arith.constant 1 : index
    %c0_2 = arith.constant 0 : index
    %c0_3 = arith.constant 0 : index
    %2 = vector.load %arg1[%c1, %c0_2, %c0_3] : memref<4x32x32xf32, #tpu.memory_space<vmem>>, vector<1x32x32xf32>
    %3 = vector.shape_cast %2 : vector<1x32x32xf32> to vector<32x32xf32>
    %c2 = arith.constant 2 : index
    %c0_4 = arith.constant 0 : index
    %c0_5 = arith.constant 0 : index
    %4 = vector.load %arg1[%c2, %c0_4, %c0_5] : memref<4x32x32xf32, #tpu.memory_space<vmem>>, vector<1x32x32xf32>
    %5 = vector.shape_cast %4 : vector<1x32x32xf32> to vector<32x32xf32>
    %c3 = arith.constant 3 : index
    %c0_6 = arith.constant 0 : index
    %c0_7 = arith.constant 0 : index
    %6 = vector.load %arg1[%c3, %c0_6, %c0_7] : memref<4x32x32xf32, #tpu.memory_space<vmem>>, vector<1x32x32xf32>
    %7 = vector.shape_cast %6 : vector<1x32x32xf32> to vector<32x32xf32>
    %cst = arith.constant 0.000000e+00 : f32
    %8 = vector.broadcast %cst : f32 to vector<2x32xf32>
    %cst_8 = arith.constant 0.000000e+00 : f32
    %9 = vector.broadcast %cst_8 : f32 to vector<2x32xf32>
    %c0_i32 = arith.constant 0 : i32
    %10 = arith.index_cast %c0_i32 : i32 to index
    %c0_9 = arith.constant 0 : index
    %c0_10 = arith.constant 0 : index
    %c0_11 = arith.constant 0 : index
    %11 = vector.load %arg0[%10, %c0_9, %c0_10, %c0_11] : memref<8x4x2x32xf32, #tpu.memory_space<vmem>>, vector<1x4x2x32xf32>
    %12 = vector.shape_cast %11 : vector<1x4x2x32xf32> to vector<4x2x32xf32>
    %13 = vector.extract_strided_slice %12 {offsets = [0, 0, 0], sizes = [1, 2, 32], strides = [1, 1, 1]} : vector<4x2x32xf32> to vector<1x2x32xf32>
    %14 = vector.shape_cast %13 : vector<1x2x32xf32> to vector<2x32xf32>
    %cst_12 = arith.constant dense<0.000000e+00> : vector<2x32xf32>
    %15 = tpu.matmul %8, %1, %cst_12 {dimension_numbers = #tpu.dot_dimension_numbers<[1], [0], [0], [1], [0, 0, 1, 1], [], []>} : vector<2x32xf32>, vector<32x32xf32>, vector<2x32xf32> -> vector<2x32xf32>
    %16 = arith.addf %14, %15 : vector<2x32xf32>
    %17 = vector.extract_strided_slice %12 {offsets = [1, 0, 0], sizes = [1, 2, 32], strides = [1, 1, 1]} : vector<4x2x32xf32> to vector<1x2x32xf32>
    %18 = vector.shape_cast %17 : vector<1x2x32xf32> to vector<2x32xf32>
    %cst_13 = arith.constant dense<0.000000e+00> : vector<2x32xf32>
    %19 = tpu.matmul %8, %3, %cst_13 {dimension_numbers = #tpu.dot_dimension_numbers<[1], [0], [0], [1], [0, 0, 1, 1], [], []>} : vector<2x32xf32>, vector<32x32xf32>, vector<2x32xf32> -> vector<2x32xf32>
    %20 = arith.addf %18, %19 : vector<2x32xf32>
    %21 = vector.extract_strided_slice %12 {offsets = [2, 0, 0], sizes = [1, 2, 32], strides = [1, 1, 1]} : vector<4x2x32xf32> to vector<1x2x32xf32>
    %22 = vector.shape_cast %21 : vector<1x2x32xf32> to vector<2x32xf32>
    %cst_14 = arith.constant dense<0.000000e+00> : vector<2x32xf32>
    %23 = tpu.matmul %8, %5, %cst_14 {dimension_numbers = #tpu.dot_dimension_numbers<[1], [0], [0], [1], [0, 0, 1, 1], [], []>} : vector<2x32xf32>, vector<32x32xf32>, vector<2x32xf32> -> vector<2x32xf32>
    %24 = arith.addf %22, %23 : vector<2x32xf32>
    %25 = vector.extract_strided_slice %12 {offsets = [3, 0, 0], sizes = [1, 2, 32], strides = [1, 1, 1]} : vector<4x2x32xf32> to vector<1x2x32xf32>
    %26 = vector.shape_cast %25 : vector<1x2x32xf32> to vector<2x32xf32>
    %cst_15 = arith.constant dense<0.000000e+00> : vector<2x32xf32>
    %27 = tpu.matmul %8, %7, %cst_15 {dimension_numbers = #tpu.dot_dimension_numbers<[1], [0], [0], [1], [0, 0, 1, 1], [], []>} : vector<2x32xf32>, vector<32x32xf32>, vector<2x32xf32> -> vector<2x32xf32>
    %28 = arith.addf %26, %27 : vector<2x32xf32>
    %29 = arith.negf %16 : vector<2x32xf32>
    %30 = math.exp %29 : vector<2x32xf32>
    %cst_16 = arith.constant 1.000000e+00 : f32
    %31 = vector.broadcast %cst_16 : f32 to vector<2x32xf32>
    %32 = arith.addf %31, %30 : vector<2x32xf32>
    %33 = arith.divf %31, %32 : vector<2x32xf32>
    %34 = arith.negf %20 : vector<2x32xf32>
    %35 = math.exp %34 : vector<2x32xf32>
    %cst_17 = arith.constant 1.000000e+00 : f32
    %36 = vector.broadcast %cst_17 : f32 to vector<2x32xf32>
    %37 = arith.addf %36, %35 : vector<2x32xf32>
    %38 = arith.divf %36, %37 : vector<2x32xf32>
    %39 = math.tanh %24 : vector<2x32xf32>
    %40 = arith.negf %28 : vector<2x32xf32>
    %41 = math.exp %40 : vector<2x32xf32>
    %cst_18 = arith.constant 1.000000e+00 : f32
    %42 = vector.broadcast %cst_18 : f32 to vector<2x32xf32>
    %43 = arith.addf %42, %41 : vector<2x32xf32>
    %44 = arith.divf %42, %43 : vector<2x32xf32>
    %45 = arith.mulf %38, %9 : vector<2x32xf32>
    %46 = arith.mulf %33, %39 : vector<2x32xf32>
    %47 = arith.addf %45, %46 : vector<2x32xf32>
    %48 = math.tanh %47 : vector<2x32xf32>
    %49 = arith.mulf %44, %48 : vector<2x32xf32>
    %c1_i32 = arith.constant 1 : i32
    %50 = arith.index_cast %c1_i32 : i32 to index
    %c0_19 = arith.constant 0 : index
    %c0_20 = arith.constant 0 : index
    %c0_21 = arith.constant 0 : index
    %51 = vector.load %arg0[%50, %c0_19, %c0_20, %c0_21] : memref<8x4x2x32xf32, #tpu.memory_space<vmem>>, vector<1x4x2x32xf32>
    %52 = vector.shape_cast %51 : vector<1x4x2x32xf32> to vector<4x2x32xf32>
    %53 = vector.extract_strided_slice %52 {offsets = [0, 0, 0], sizes = [1, 2, 32], strides = [1, 1, 1]} : vector<4x2x32xf32> to vector<1x2x32xf32>
    %54 = vector.shape_cast %53 : vector<1x2x32xf32> to vector<2x32xf32>
    %cst_22 = arith.constant dense<0.000000e+00> : vector<2x32xf32>
    %55 = tpu.matmul %49, %1, %cst_22 {dimension_numbers = #tpu.dot_dimension_numbers<[1], [0], [0], [1], [0, 0, 1, 1], [], []>} : vector<2x32xf32>, vector<32x32xf32>, vector<2x32xf32> -> vector<2x32xf32>
    %56 = arith.addf %54, %55 : vector<2x32xf32>
    %57 = vector.extract_strided_slice %52 {offsets = [1, 0, 0], sizes = [1, 2, 32], strides = [1, 1, 1]} : vector<4x2x32xf32> to vector<1x2x32xf32>
    %58 = vector.shape_cast %57 : vector<1x2x32xf32> to vector<2x32xf32>
    %cst_23 = arith.constant dense<0.000000e+00> : vector<2x32xf32>
    %59 = tpu.matmul %49, %3, %cst_23 {dimension_numbers = #tpu.dot_dimension_numbers<[1], [0], [0], [1], [0, 0, 1, 1], [], []>} : vector<2x32xf32>, vector<32x32xf32>, vector<2x32xf32> -> vector<2x32xf32>
    %60 = arith.addf %58, %59 : vector<2x32xf32>
    %61 = vector.extract_strided_slice %52 {offsets = [2, 0, 0], sizes = [1, 2, 32], strides = [1, 1, 1]} : vector<4x2x32xf32> to vector<1x2x32xf32>
    %62 = vector.shape_cast %61 : vector<1x2x32xf32> to vector<2x32xf32>
    %cst_24 = arith.constant dense<0.000000e+00> : vector<2x32xf32>
    %63 = tpu.matmul %49, %5, %cst_24 {dimension_numbers = #tpu.dot_dimension_numbers<[1], [0], [0], [1], [0, 0, 1, 1], [], []>} : vector<2x32xf32>, vector<32x32xf32>, vector<2x32xf32> -> vector<2x32xf32>
    %64 = arith.addf %62, %63 : vector<2x32xf32>
    %65 = vector.extract_strided_slice %52 {offsets = [3, 0, 0], sizes = [1, 2, 32], strides = [1, 1, 1]} : vector<4x2x32xf32> to vector<1x2x32xf32>
    %66 = vector.shape_cast %65 : vector<1x2x32xf32> to vector<2x32xf32>
    %cst_25 = arith.constant dense<0.000000e+00> : vector<2x32xf32>
    %67 = tpu.matmul %49, %7, %cst_25 {dimension_numbers = #tpu.dot_dimension_numbers<[1], [0], [0], [1], [0, 0, 1, 1], [], []>} : vector<2x32xf32>, vector<32x32xf32>, vector<2x32xf32> -> vector<2x32xf32>
    %68 = arith.addf %66, %67 : vector<2x32xf32>
    %69 = arith.negf %56 : vector<2x32xf32>
    %70 = math.exp %69 : vector<2x32xf32>
    %cst_26 = arith.constant 1.000000e+00 : f32
    %71 = vector.broadcast %cst_26 : f32 to vector<2x32xf32>
    %72 = arith.addf %71, %70 : vector<2x32xf32>
    %73 = arith.divf %71, %72 : vector<2x32xf32>
    %74 = arith.negf %60 : vector<2x32xf32>
    %75 = math.exp %74 : vector<2x32xf32>
    %cst_27 = arith.constant 1.000000e+00 : f32
    %76 = vector.broadcast %cst_27 : f32 to vector<2x32xf32>
    %77 = arith.addf %76, %75 : vector<2x32xf32>
    %78 = arith.divf %76, %77 : vector<2x32xf32>
    %79 = math.tanh %64 : vector<2x32xf32>
    %80 = arith.negf %68 : vector<2x32xf32>
    %81 = math.exp %80 : vector<2x32xf32>
    %cst_28 = arith.constant 1.000000e+00 : f32
    %82 = vector.broadcast %cst_28 : f32 to vector<2x32xf32>
    %83 = arith.addf %82, %81 : vector<2x32xf32>
    %84 = arith.divf %82, %83 : vector<2x32xf32>
    %85 = arith.mulf %78, %47 : vector<2x32xf32>
    %86 = arith.mulf %73, %79 : vector<2x32xf32>
    %87 = arith.addf %85, %86 : vector<2x32xf32>
    %88 = math.tanh %87 : vector<2x32xf32>
    %89 = arith.mulf %84, %88 : vector<2x32xf32>
    %c2_i32 = arith.constant 2 : i32
    %90 = arith.index_cast %c2_i32 : i32 to index
    %c0_29 = arith.constant 0 : index
    %c0_30 = arith.constant 0 : index
    %c0_31 = arith.constant 0 : index
    %91 = vector.load %arg0[%90, %c0_29, %c0_30, %c0_31] : memref<8x4x2x32xf32, #tpu.memory_space<vmem>>, vector<1x4x2x32xf32>
    %92 = vector.shape_cast %91 : vector<1x4x2x32xf32> to vector<4x2x32xf32>
    %93 = vector.extract_strided_slice %92 {offsets = [0, 0, 0], sizes = [1, 2, 32], strides = [1, 1, 1]} : vector<4x2x32xf32> to vector<1x2x32xf32>
    %94 = vector.shape_cast %93 : vector<1x2x32xf32> to vector<2x32xf32>
    %cst_32 = arith.constant dense<0.000000e+00> : vector<2x32xf32>
    %95 = tpu.matmul %89, %1, %cst_32 {dimension_numbers = #tpu.dot_dimension_numbers<[1], [0], [0], [1], [0, 0, 1, 1], [], []>} : vector<2x32xf32>, vector<32x32xf32>, vector<2x32xf32> -> vector<2x32xf32>
    %96 = arith.addf %94, %95 : vector<2x32xf32>
    %97 = vector.extract_strided_slice %92 {offsets = [1, 0, 0], sizes = [1, 2, 32], strides = [1, 1, 1]} : vector<4x2x32xf32> to vector<1x2x32xf32>
    %98 = vector.shape_cast %97 : vector<1x2x32xf32> to vector<2x32xf32>
    %cst_33 = arith.constant dense<0.000000e+00> : vector<2x32xf32>
    %99 = tpu.matmul %89, %3, %cst_33 {dimension_numbers = #tpu.dot_dimension_numbers<[1], [0], [0], [1], [0, 0, 1, 1], [], []>} : vector<2x32xf32>, vector<32x32xf32>, vector<2x32xf32> -> vector<2x32xf32>
    %100 = arith.addf %98, %99 : vector<2x32xf32>
    %101 = vector.extract_strided_slice %92 {offsets = [2, 0, 0], sizes = [1, 2, 32], strides = [1, 1, 1]} : vector<4x2x32xf32> to vector<1x2x32xf32>
    %102 = vector.shape_cast %101 : vector<1x2x32xf32> to vector<2x32xf32>
    %cst_34 = arith.constant dense<0.000000e+00> : vector<2x32xf32>
    %103 = tpu.matmul %89, %5, %cst_34 {dimension_numbers = #tpu.dot_dimension_numbers<[1], [0], [0], [1], [0, 0, 1, 1], [], []>} : vector<2x32xf32>, vector<32x32xf32>, vector<2x32xf32> -> vector<2x32xf32>
    %104 = arith.addf %102, %103 : vector<2x32xf32>
    %105 = vector.extract_strided_slice %92 {offsets = [3, 0, 0], sizes = [1, 2, 32], strides = [1, 1, 1]} : vector<4x2x32xf32> to vector<1x2x32xf32>
    %106 = vector.shape_cast %105 : vector<1x2x32xf32> to vector<2x32xf32>
    %cst_35 = arith.constant dense<0.000000e+00> : vector<2x32xf32>
    %107 = tpu.matmul %89, %7, %cst_35 {dimension_numbers = #tpu.dot_dimension_numbers<[1], [0], [0], [1], [0, 0, 1, 1], [], []>} : vector<2x32xf32>, vector<32x32xf32>, vector<2x32xf32> -> vector<2x32xf32>
    %108 = arith.addf %106, %107 : vector<2x32xf32>
    %109 = arith.negf %96 : vector<2x32xf32>
    %110 = math.exp %109 : vector<2x32xf32>
    %cst_36 = arith.constant 1.000000e+00 : f32
    %111 = vector.broadcast %cst_36 : f32 to vector<2x32xf32>
    %112 = arith.addf %111, %110 : vector<2x32xf32>
    %113 = arith.divf %111, %112 : vector<2x32xf32>
    %114 = arith.negf %100 : vector<2x32xf32>
    %115 = math.exp %114 : vector<2x32xf32>
    %cst_37 = arith.constant 1.000000e+00 : f32
    %116 = vector.broadcast %cst_37 : f32 to vector<2x32xf32>
    %117 = arith.addf %116, %115 : vector<2x32xf32>
    %118 = arith.divf %116, %117 : vector<2x32xf32>
    %119 = math.tanh %104 : vector<2x32xf32>
    %120 = arith.negf %108 : vector<2x32xf32>
    %121 = math.exp %120 : vector<2x32xf32>
    %cst_38 = arith.constant 1.000000e+00 : f32
    %122 = vector.broadcast %cst_38 : f32 to vector<2x32xf32>
    %123 = arith.addf %122, %121 : vector<2x32xf32>
    %124 = arith.divf %122, %123 : vector<2x32xf32>
    %125 = arith.mulf %118, %87 : vector<2x32xf32>
    %126 = arith.mulf %113, %119 : vector<2x32xf32>
    %127 = arith.addf %125, %126 : vector<2x32xf32>
    %128 = math.tanh %127 : vector<2x32xf32>
    %129 = arith.mulf %124, %128 : vector<2x32xf32>
    %c3_i32 = arith.constant 3 : i32
    %130 = arith.index_cast %c3_i32 : i32 to index
    %c0_39 = arith.constant 0 : index
    %c0_40 = arith.constant 0 : index
    %c0_41 = arith.constant 0 : index
    %131 = vector.load %arg0[%130, %c0_39, %c0_40, %c0_41] : memref<8x4x2x32xf32, #tpu.memory_space<vmem>>, vector<1x4x2x32xf32>
    %132 = vector.shape_cast %131 : vector<1x4x2x32xf32> to vector<4x2x32xf32>
    %133 = vector.extract_strided_slice %132 {offsets = [0, 0, 0], sizes = [1, 2, 32], strides = [1, 1, 1]} : vector<4x2x32xf32> to vector<1x2x32xf32>
    %134 = vector.shape_cast %133 : vector<1x2x32xf32> to vector<2x32xf32>
    %cst_42 = arith.constant dense<0.000000e+00> : vector<2x32xf32>
    %135 = tpu.matmul %129, %1, %cst_42 {dimension_numbers = #tpu.dot_dimension_numbers<[1], [0], [0], [1], [0, 0, 1, 1], [], []>} : vector<2x32xf32>, vector<32x32xf32>, vector<2x32xf32> -> vector<2x32xf32>
    %136 = arith.addf %134, %135 : vector<2x32xf32>
    %137 = vector.extract_strided_slice %132 {offsets = [1, 0, 0], sizes = [1, 2, 32], strides = [1, 1, 1]} : vector<4x2x32xf32> to vector<1x2x32xf32>
    %138 = vector.shape_cast %137 : vector<1x2x32xf32> to vector<2x32xf32>
    %cst_43 = arith.constant dense<0.000000e+00> : vector<2x32xf32>
    %139 = tpu.matmul %129, %3, %cst_43 {dimension_numbers = #tpu.dot_dimension_numbers<[1], [0], [0], [1], [0, 0, 1, 1], [], []>} : vector<2x32xf32>, vector<32x32xf32>, vector<2x32xf32> -> vector<2x32xf32>
    %140 = arith.addf %138, %139 : vector<2x32xf32>
    %141 = vector.extract_strided_slice %132 {offsets = [2, 0, 0], sizes = [1, 2, 32], strides = [1, 1, 1]} : vector<4x2x32xf32> to vector<1x2x32xf32>
    %142 = vector.shape_cast %141 : vector<1x2x32xf32> to vector<2x32xf32>
    %cst_44 = arith.constant dense<0.000000e+00> : vector<2x32xf32>
    %143 = tpu.matmul %129, %5, %cst_44 {dimension_numbers = #tpu.dot_dimension_numbers<[1], [0], [0], [1], [0, 0, 1, 1], [], []>} : vector<2x32xf32>, vector<32x32xf32>, vector<2x32xf32> -> vector<2x32xf32>
    %144 = arith.addf %142, %143 : vector<2x32xf32>
    %145 = vector.extract_strided_slice %132 {offsets = [3, 0, 0], sizes = [1, 2, 32], strides = [1, 1, 1]} : vector<4x2x32xf32> to vector<1x2x32xf32>
    %146 = vector.shape_cast %145 : vector<1x2x32xf32> to vector<2x32xf32>
    %cst_45 = arith.constant dense<0.000000e+00> : vector<2x32xf32>
    %147 = tpu.matmul %129, %7, %cst_45 {dimension_numbers = #tpu.dot_dimension_numbers<[1], [0], [0], [1], [0, 0, 1, 1], [], []>} : vector<2x32xf32>, vector<32x32xf32>, vector<2x32xf32> -> vector<2x32xf32>
    %148 = arith.addf %146, %147 : vector<2x32xf32>
    %149 = arith.negf %136 : vector<2x32xf32>
    %150 = math.exp %149 : vector<2x32xf32>
    %cst_46 = arith.constant 1.000000e+00 : f32
    %151 = vector.broadcast %cst_46 : f32 to vector<2x32xf32>
    %152 = arith.addf %151, %150 : vector<2x32xf32>
    %153 = arith.divf %151, %152 : vector<2x32xf32>
    %154 = arith.negf %140 : vector<2x32xf32>
    %155 = math.exp %154 : vector<2x32xf32>
    %cst_47 = arith.constant 1.000000e+00 : f32
    %156 = vector.broadcast %cst_47 : f32 to vector<2x32xf32>
    %157 = arith.addf %156, %155 : vector<2x32xf32>
    %158 = arith.divf %156, %157 : vector<2x32xf32>
    %159 = math.tanh %144 : vector<2x32xf32>
    %160 = arith.negf %148 : vector<2x32xf32>
    %161 = math.exp %160 : vector<2x32xf32>
    %cst_48 = arith.constant 1.000000e+00 : f32
    %162 = vector.broadcast %cst_48 : f32 to vector<2x32xf32>
    %163 = arith.addf %162, %161 : vector<2x32xf32>
    %164 = arith.divf %162, %163 : vector<2x32xf32>
    %165 = arith.mulf %158, %127 : vector<2x32xf32>
    %166 = arith.mulf %153, %159 : vector<2x32xf32>
    %167 = arith.addf %165, %166 : vector<2x32xf32>
    %168 = math.tanh %167 : vector<2x32xf32>
    %169 = arith.mulf %164, %168 : vector<2x32xf32>
    %c4_i32 = arith.constant 4 : i32
    %170 = arith.index_cast %c4_i32 : i32 to index
    %c0_49 = arith.constant 0 : index
    %c0_50 = arith.constant 0 : index
    %c0_51 = arith.constant 0 : index
    %171 = vector.load %arg0[%170, %c0_49, %c0_50, %c0_51] : memref<8x4x2x32xf32, #tpu.memory_space<vmem>>, vector<1x4x2x32xf32>
    %172 = vector.shape_cast %171 : vector<1x4x2x32xf32> to vector<4x2x32xf32>
    %173 = vector.extract_strided_slice %172 {offsets = [0, 0, 0], sizes = [1, 2, 32], strides = [1, 1, 1]} : vector<4x2x32xf32> to vector<1x2x32xf32>
    %174 = vector.shape_cast %173 : vector<1x2x32xf32> to vector<2x32xf32>
    %cst_52 = arith.constant dense<0.000000e+00> : vector<2x32xf32>
    %175 = tpu.matmul %169, %1, %cst_52 {dimension_numbers = #tpu.dot_dimension_numbers<[1], [0], [0], [1], [0, 0, 1, 1], [], []>} : vector<2x32xf32>, vector<32x32xf32>, vector<2x32xf32> -> vector<2x32xf32>
    %176 = arith.addf %174, %175 : vector<2x32xf32>
    %177 = vector.extract_strided_slice %172 {offsets = [1, 0, 0], sizes = [1, 2, 32], strides = [1, 1, 1]} : vector<4x2x32xf32> to vector<1x2x32xf32>
    %178 = vector.shape_cast %177 : vector<1x2x32xf32> to vector<2x32xf32>
    %cst_53 = arith.constant dense<0.000000e+00> : vector<2x32xf32>
    %179 = tpu.matmul %169, %3, %cst_53 {dimension_numbers = #tpu.dot_dimension_numbers<[1], [0], [0], [1], [0, 0, 1, 1], [], []>} : vector<2x32xf32>, vector<32x32xf32>, vector<2x32xf32> -> vector<2x32xf32>
    %180 = arith.addf %178, %179 : vector<2x32xf32>
    %181 = vector.extract_strided_slice %172 {offsets = [2, 0, 0], sizes = [1, 2, 32], strides = [1, 1, 1]} : vector<4x2x32xf32> to vector<1x2x32xf32>
    %182 = vector.shape_cast %181 : vector<1x2x32xf32> to vector<2x32xf32>
    %cst_54 = arith.constant dense<0.000000e+00> : vector<2x32xf32>
    %183 = tpu.matmul %169, %5, %cst_54 {dimension_numbers = #tpu.dot_dimension_numbers<[1], [0], [0], [1], [0, 0, 1, 1], [], []>} : vector<2x32xf32>, vector<32x32xf32>, vector<2x32xf32> -> vector<2x32xf32>
    %184 = arith.addf %182, %183 : vector<2x32xf32>
    %185 = vector.extract_strided_slice %172 {offsets = [3, 0, 0], sizes = [1, 2, 32], strides = [1, 1, 1]} : vector<4x2x32xf32> to vector<1x2x32xf32>
    %186 = vector.shape_cast %185 : vector<1x2x32xf32> to vector<2x32xf32>
    %cst_55 = arith.constant dense<0.000000e+00> : vector<2x32xf32>
    %187 = tpu.matmul %169, %7, %cst_55 {dimension_numbers = #tpu.dot_dimension_numbers<[1], [0], [0], [1], [0, 0, 1, 1], [], []>} : vector<2x32xf32>, vector<32x32xf32>, vector<2x32xf32> -> vector<2x32xf32>
    %188 = arith.addf %186, %187 : vector<2x32xf32>
    %189 = arith.negf %176 : vector<2x32xf32>
    %190 = math.exp %189 : vector<2x32xf32>
    %cst_56 = arith.constant 1.000000e+00 : f32
    %191 = vector.broadcast %cst_56 : f32 to vector<2x32xf32>
    %192 = arith.addf %191, %190 : vector<2x32xf32>
    %193 = arith.divf %191, %192 : vector<2x32xf32>
    %194 = arith.negf %180 : vector<2x32xf32>
    %195 = math.exp %194 : vector<2x32xf32>
    %cst_57 = arith.constant 1.000000e+00 : f32
    %196 = vector.broadcast %cst_57 : f32 to vector<2x32xf32>
    %197 = arith.addf %196, %195 : vector<2x32xf32>
    %198 = arith.divf %196, %197 : vector<2x32xf32>
    %199 = math.tanh %184 : vector<2x32xf32>
    %200 = arith.negf %188 : vector<2x32xf32>
    %201 = math.exp %200 : vector<2x32xf32>
    %cst_58 = arith.constant 1.000000e+00 : f32
    %202 = vector.broadcast %cst_58 : f32 to vector<2x32xf32>
    %203 = arith.addf %202, %201 : vector<2x32xf32>
    %204 = arith.divf %202, %203 : vector<2x32xf32>
    %205 = arith.mulf %198, %167 : vector<2x32xf32>
    %206 = arith.mulf %193, %199 : vector<2x32xf32>
    %207 = arith.addf %205, %206 : vector<2x32xf32>
    %208 = math.tanh %207 : vector<2x32xf32>
    %209 = arith.mulf %204, %208 : vector<2x32xf32>
    %c5_i32 = arith.constant 5 : i32
    %210 = arith.index_cast %c5_i32 : i32 to index
    %c0_59 = arith.constant 0 : index
    %c0_60 = arith.constant 0 : index
    %c0_61 = arith.constant 0 : index
    %211 = vector.load %arg0[%210, %c0_59, %c0_60, %c0_61] : memref<8x4x2x32xf32, #tpu.memory_space<vmem>>, vector<1x4x2x32xf32>
    %212 = vector.shape_cast %211 : vector<1x4x2x32xf32> to vector<4x2x32xf32>
    %213 = vector.extract_strided_slice %212 {offsets = [0, 0, 0], sizes = [1, 2, 32], strides = [1, 1, 1]} : vector<4x2x32xf32> to vector<1x2x32xf32>
    %214 = vector.shape_cast %213 : vector<1x2x32xf32> to vector<2x32xf32>
    %cst_62 = arith.constant dense<0.000000e+00> : vector<2x32xf32>
    %215 = tpu.matmul %209, %1, %cst_62 {dimension_numbers = #tpu.dot_dimension_numbers<[1], [0], [0], [1], [0, 0, 1, 1], [], []>} : vector<2x32xf32>, vector<32x32xf32>, vector<2x32xf32> -> vector<2x32xf32>
    %216 = arith.addf %214, %215 : vector<2x32xf32>
    %217 = vector.extract_strided_slice %212 {offsets = [1, 0, 0], sizes = [1, 2, 32], strides = [1, 1, 1]} : vector<4x2x32xf32> to vector<1x2x32xf32>
    %218 = vector.shape_cast %217 : vector<1x2x32xf32> to vector<2x32xf32>
    %cst_63 = arith.constant dense<0.000000e+00> : vector<2x32xf32>
    %219 = tpu.matmul %209, %3, %cst_63 {dimension_numbers = #tpu.dot_dimension_numbers<[1], [0], [0], [1], [0, 0, 1, 1], [], []>} : vector<2x32xf32>, vector<32x32xf32>, vector<2x32xf32> -> vector<2x32xf32>
    %220 = arith.addf %218, %219 : vector<2x32xf32>
    %221 = vector.extract_strided_slice %212 {offsets = [2, 0, 0], sizes = [1, 2, 32], strides = [1, 1, 1]} : vector<4x2x32xf32> to vector<1x2x32xf32>
    %222 = vector.shape_cast %221 : vector<1x2x32xf32> to vector<2x32xf32>
    %cst_64 = arith.constant dense<0.000000e+00> : vector<2x32xf32>
    %223 = tpu.matmul %209, %5, %cst_64 {dimension_numbers = #tpu.dot_dimension_numbers<[1], [0], [0], [1], [0, 0, 1, 1], [], []>} : vector<2x32xf32>, vector<32x32xf32>, vector<2x32xf32> -> vector<2x32xf32>
    %224 = arith.addf %222, %223 : vector<2x32xf32>
    %225 = vector.extract_strided_slice %212 {offsets = [3, 0, 0], sizes = [1, 2, 32], strides = [1, 1, 1]} : vector<4x2x32xf32> to vector<1x2x32xf32>
    %226 = vector.shape_cast %225 : vector<1x2x32xf32> to vector<2x32xf32>
    %cst_65 = arith.constant dense<0.000000e+00> : vector<2x32xf32>
    %227 = tpu.matmul %209, %7, %cst_65 {dimension_numbers = #tpu.dot_dimension_numbers<[1], [0], [0], [1], [0, 0, 1, 1], [], []>} : vector<2x32xf32>, vector<32x32xf32>, vector<2x32xf32> -> vector<2x32xf32>
    %228 = arith.addf %226, %227 : vector<2x32xf32>
    %229 = arith.negf %216 : vector<2x32xf32>
    %230 = math.exp %229 : vector<2x32xf32>
    %cst_66 = arith.constant 1.000000e+00 : f32
    %231 = vector.broadcast %cst_66 : f32 to vector<2x32xf32>
    %232 = arith.addf %231, %230 : vector<2x32xf32>
    %233 = arith.divf %231, %232 : vector<2x32xf32>
    %234 = arith.negf %220 : vector<2x32xf32>
    %235 = math.exp %234 : vector<2x32xf32>
    %cst_67 = arith.constant 1.000000e+00 : f32
    %236 = vector.broadcast %cst_67 : f32 to vector<2x32xf32>
    %237 = arith.addf %236, %235 : vector<2x32xf32>
    %238 = arith.divf %236, %237 : vector<2x32xf32>
    %239 = math.tanh %224 : vector<2x32xf32>
    %240 = arith.negf %228 : vector<2x32xf32>
    %241 = math.exp %240 : vector<2x32xf32>
    %cst_68 = arith.constant 1.000000e+00 : f32
    %242 = vector.broadcast %cst_68 : f32 to vector<2x32xf32>
    %243 = arith.addf %242, %241 : vector<2x32xf32>
    %244 = arith.divf %242, %243 : vector<2x32xf32>
    %245 = arith.mulf %238, %207 : vector<2x32xf32>
    %246 = arith.mulf %233, %239 : vector<2x32xf32>
    %247 = arith.addf %245, %246 : vector<2x32xf32>
    %248 = math.tanh %247 : vector<2x32xf32>
    %249 = arith.mulf %244, %248 : vector<2x32xf32>
    %c6_i32 = arith.constant 6 : i32
    %250 = arith.index_cast %c6_i32 : i32 to index
    %c0_69 = arith.constant 0 : index
    %c0_70 = arith.constant 0 : index
    %c0_71 = arith.constant 0 : index
    %251 = vector.load %arg0[%250, %c0_69, %c0_70, %c0_71] : memref<8x4x2x32xf32, #tpu.memory_space<vmem>>, vector<1x4x2x32xf32>
    %252 = vector.shape_cast %251 : vector<1x4x2x32xf32> to vector<4x2x32xf32>
    %253 = vector.extract_strided_slice %252 {offsets = [0, 0, 0], sizes = [1, 2, 32], strides = [1, 1, 1]} : vector<4x2x32xf32> to vector<1x2x32xf32>
    %254 = vector.shape_cast %253 : vector<1x2x32xf32> to vector<2x32xf32>
    %cst_72 = arith.constant dense<0.000000e+00> : vector<2x32xf32>
    %255 = tpu.matmul %249, %1, %cst_72 {dimension_numbers = #tpu.dot_dimension_numbers<[1], [0], [0], [1], [0, 0, 1, 1], [], []>} : vector<2x32xf32>, vector<32x32xf32>, vector<2x32xf32> -> vector<2x32xf32>
    %256 = arith.addf %254, %255 : vector<2x32xf32>
    %257 = vector.extract_strided_slice %252 {offsets = [1, 0, 0], sizes = [1, 2, 32], strides = [1, 1, 1]} : vector<4x2x32xf32> to vector<1x2x32xf32>
    %258 = vector.shape_cast %257 : vector<1x2x32xf32> to vector<2x32xf32>
    %cst_73 = arith.constant dense<0.000000e+00> : vector<2x32xf32>
    %259 = tpu.matmul %249, %3, %cst_73 {dimension_numbers = #tpu.dot_dimension_numbers<[1], [0], [0], [1], [0, 0, 1, 1], [], []>} : vector<2x32xf32>, vector<32x32xf32>, vector<2x32xf32> -> vector<2x32xf32>
    %260 = arith.addf %258, %259 : vector<2x32xf32>
    %261 = vector.extract_strided_slice %252 {offsets = [2, 0, 0], sizes = [1, 2, 32], strides = [1, 1, 1]} : vector<4x2x32xf32> to vector<1x2x32xf32>
    %262 = vector.shape_cast %261 : vector<1x2x32xf32> to vector<2x32xf32>
    %cst_74 = arith.constant dense<0.000000e+00> : vector<2x32xf32>
    %263 = tpu.matmul %249, %5, %cst_74 {dimension_numbers = #tpu.dot_dimension_numbers<[1], [0], [0], [1], [0, 0, 1, 1], [], []>} : vector<2x32xf32>, vector<32x32xf32>, vector<2x32xf32> -> vector<2x32xf32>
    %264 = arith.addf %262, %263 : vector<2x32xf32>
    %265 = vector.extract_strided_slice %252 {offsets = [3, 0, 0], sizes = [1, 2, 32], strides = [1, 1, 1]} : vector<4x2x32xf32> to vector<1x2x32xf32>
    %266 = vector.shape_cast %265 : vector<1x2x32xf32> to vector<2x32xf32>
    %cst_75 = arith.constant dense<0.000000e+00> : vector<2x32xf32>
    %267 = tpu.matmul %249, %7, %cst_75 {dimension_numbers = #tpu.dot_dimension_numbers<[1], [0], [0], [1], [0, 0, 1, 1], [], []>} : vector<2x32xf32>, vector<32x32xf32>, vector<2x32xf32> -> vector<2x32xf32>
    %268 = arith.addf %266, %267 : vector<2x32xf32>
    %269 = arith.negf %256 : vector<2x32xf32>
    %270 = math.exp %269 : vector<2x32xf32>
    %cst_76 = arith.constant 1.000000e+00 : f32
    %271 = vector.broadcast %cst_76 : f32 to vector<2x32xf32>
    %272 = arith.addf %271, %270 : vector<2x32xf32>
    %273 = arith.divf %271, %272 : vector<2x32xf32>
    %274 = arith.negf %260 : vector<2x32xf32>
    %275 = math.exp %274 : vector<2x32xf32>
    %cst_77 = arith.constant 1.000000e+00 : f32
    %276 = vector.broadcast %cst_77 : f32 to vector<2x32xf32>
    %277 = arith.addf %276, %275 : vector<2x32xf32>
    %278 = arith.divf %276, %277 : vector<2x32xf32>
    %279 = math.tanh %264 : vector<2x32xf32>
    %280 = arith.negf %268 : vector<2x32xf32>
    %281 = math.exp %280 : vector<2x32xf32>
    %cst_78 = arith.constant 1.000000e+00 : f32
    %282 = vector.broadcast %cst_78 : f32 to vector<2x32xf32>
    %283 = arith.addf %282, %281 : vector<2x32xf32>
    %284 = arith.divf %282, %283 : vector<2x32xf32>
    %285 = arith.mulf %278, %247 : vector<2x32xf32>
    %286 = arith.mulf %273, %279 : vector<2x32xf32>
    %287 = arith.addf %285, %286 : vector<2x32xf32>
    %288 = math.tanh %287 : vector<2x32xf32>
    %289 = arith.mulf %284, %288 : vector<2x32xf32>
    %c7_i32 = arith.constant 7 : i32
    %290 = arith.index_cast %c7_i32 : i32 to index
    %c0_79 = arith.constant 0 : index
    %c0_80 = arith.constant 0 : index
    %c0_81 = arith.constant 0 : index
    %291 = vector.load %arg0[%290, %c0_79, %c0_80, %c0_81] : memref<8x4x2x32xf32, #tpu.memory_space<vmem>>, vector<1x4x2x32xf32>
    %292 = vector.shape_cast %291 : vector<1x4x2x32xf32> to vector<4x2x32xf32>
    %293 = vector.extract_strided_slice %292 {offsets = [0, 0, 0], sizes = [1, 2, 32], strides = [1, 1, 1]} : vector<4x2x32xf32> to vector<1x2x32xf32>
    %294 = vector.shape_cast %293 : vector<1x2x32xf32> to vector<2x32xf32>
    %cst_82 = arith.constant dense<0.000000e+00> : vector<2x32xf32>
    %295 = tpu.matmul %289, %1, %cst_82 {dimension_numbers = #tpu.dot_dimension_numbers<[1], [0], [0], [1], [0, 0, 1, 1], [], []>} : vector<2x32xf32>, vector<32x32xf32>, vector<2x32xf32> -> vector<2x32xf32>
    %296 = arith.addf %294, %295 : vector<2x32xf32>
    %297 = vector.extract_strided_slice %292 {offsets = [1, 0, 0], sizes = [1, 2, 32], strides = [1, 1, 1]} : vector<4x2x32xf32> to vector<1x2x32xf32>
    %298 = vector.shape_cast %297 : vector<1x2x32xf32> to vector<2x32xf32>
    %cst_83 = arith.constant dense<0.000000e+00> : vector<2x32xf32>
    %299 = tpu.matmul %289, %3, %cst_83 {dimension_numbers = #tpu.dot_dimension_numbers<[1], [0], [0], [1], [0, 0, 1, 1], [], []>} : vector<2x32xf32>, vector<32x32xf32>, vector<2x32xf32> -> vector<2x32xf32>
    %300 = arith.addf %298, %299 : vector<2x32xf32>
    %301 = vector.extract_strided_slice %292 {offsets = [2, 0, 0], sizes = [1, 2, 32], strides = [1, 1, 1]} : vector<4x2x32xf32> to vector<1x2x32xf32>
    %302 = vector.shape_cast %301 : vector<1x2x32xf32> to vector<2x32xf32>
    %cst_84 = arith.constant dense<0.000000e+00> : vector<2x32xf32>
    %303 = tpu.matmul %289, %5, %cst_84 {dimension_numbers = #tpu.dot_dimension_numbers<[1], [0], [0], [1], [0, 0, 1, 1], [], []>} : vector<2x32xf32>, vector<32x32xf32>, vector<2x32xf32> -> vector<2x32xf32>
    %304 = arith.addf %302, %303 : vector<2x32xf32>
    %305 = vector.extract_strided_slice %292 {offsets = [3, 0, 0], sizes = [1, 2, 32], strides = [1, 1, 1]} : vector<4x2x32xf32> to vector<1x2x32xf32>
    %306 = vector.shape_cast %305 : vector<1x2x32xf32> to vector<2x32xf32>
    %cst_85 = arith.constant dense<0.000000e+00> : vector<2x32xf32>
    %307 = tpu.matmul %289, %7, %cst_85 {dimension_numbers = #tpu.dot_dimension_numbers<[1], [0], [0], [1], [0, 0, 1, 1], [], []>} : vector<2x32xf32>, vector<32x32xf32>, vector<2x32xf32> -> vector<2x32xf32>
    %308 = arith.addf %306, %307 : vector<2x32xf32>
    %309 = arith.negf %296 : vector<2x32xf32>
    %310 = math.exp %309 : vector<2x32xf32>
    %cst_86 = arith.constant 1.000000e+00 : f32
    %311 = vector.broadcast %cst_86 : f32 to vector<2x32xf32>
    %312 = arith.addf %311, %310 : vector<2x32xf32>
    %313 = arith.divf %311, %312 : vector<2x32xf32>
    %314 = arith.negf %300 : vector<2x32xf32>
    %315 = math.exp %314 : vector<2x32xf32>
    %cst_87 = arith.constant 1.000000e+00 : f32
    %316 = vector.broadcast %cst_87 : f32 to vector<2x32xf32>
    %317 = arith.addf %316, %315 : vector<2x32xf32>
    %318 = arith.divf %316, %317 : vector<2x32xf32>
    %319 = math.tanh %304 : vector<2x32xf32>
    %320 = arith.negf %308 : vector<2x32xf32>
    %321 = math.exp %320 : vector<2x32xf32>
    %cst_88 = arith.constant 1.000000e+00 : f32
    %322 = vector.broadcast %cst_88 : f32 to vector<2x32xf32>
    %323 = arith.addf %322, %321 : vector<2x32xf32>
    %324 = arith.divf %322, %323 : vector<2x32xf32>
    %325 = arith.mulf %318, %287 : vector<2x32xf32>
    %326 = arith.mulf %313, %319 : vector<2x32xf32>
    %327 = arith.addf %325, %326 : vector<2x32xf32>
    %328 = math.tanh %327 : vector<2x32xf32>
    %329 = arith.mulf %324, %328 : vector<2x32xf32>
    %c8_i32 = arith.constant 8 : i32
    %c0_89 = arith.constant 0 : index
    %c0_90 = arith.constant 0 : index
    %330 = vector.load %arg2[%c0_89, %c0_90] : memref<32x128xf32, #tpu.memory_space<vmem>>, vector<32x128xf32>
    %cst_91 = arith.constant dense<0.000000e+00> : vector<2x128xf32>
    %331 = tpu.matmul %329, %330, %cst_91 {dimension_numbers = #tpu.dot_dimension_numbers<[1], [0], [0], [1], [0, 0, 1, 1], [], []>} : vector<2x32xf32>, vector<32x128xf32>, vector<2x128xf32> -> vector<2x128xf32>
    %c0_92 = arith.constant 0 : index
    %c0_93 = arith.constant 0 : index
    %332 = vector.load %arg3[%c0_92, %c0_93] : memref<1x128xf32, #tpu.memory_space<vmem>>, vector<1x128xf32>
    %333 = vector.broadcast %332 : vector<1x128xf32> to vector<2x128xf32>
    %334 = arith.addf %331, %333 : vector<2x128xf32>
    %c0_94 = arith.constant 0 : index
    %c0_95 = arith.constant 0 : index
    %335 = vector.load %arg4[%c0_94, %c0_95] : memref<2x128xf32, #tpu.memory_space<vmem>>, vector<2x128xf32>
    tpu.vector_store %arg4[%c0_94, %c0_95], %334 {strides = array<i32>} : memref<2x128xf32, #tpu.memory_space<vmem>>, vector<2x128xf32>,
    return
  }
}

</mosaic_0001>

<bundles_post_ra>
// kernel: lstm_module_forward.1
= control target key start
LH: loop header
LB: loop body
LE: loop exit
PB: predicated region body
PF: predicated region fallthrough
CT: control target
= control target key end

     0   :  { %v3640_v3 = vmov 0.0|0.0   ;;  %vm3641_vm0 = vmmov 0   ;;  %v3642_v11 = vmov 0.0   ;;  %s4113_s0 = inlined_call_operand.vmem [shape: f32[8,4,2,32], index: 0, kind: input, shape index: {}]   ;;  %s4114_s1 = inlined_call_operand.vmem [shape: f32[4,32,32], index: 1, kind: input, shape index: {}]   ;;  %s4115_s2 = inlined_call_operand.vmem [shape: f32[32,128], index: 2, kind: input, shape index: {}]   ;;  %s4116_s3 = inlined_call_operand.vmem [shape: f32[1,128], index: 3, kind: input, shape index: {}]   ;;  %s4117_s4 = inlined_call_operand.hbm [shape: f32[2,128], index: 4, kind: output, shape index: {}]  }
   0x1   :  { %v18_v0 = vld [vmem:[%s4114_s1] sm:$0xff]  ;;  %v19_v1 = vld [vmem:[%s4114_s1 + $0x8] sm:$0xff]  ;;  %3286 = vmatprep.subr.bf16.mxu0 %v3640_v3  ;;  %3292 = vmatprep.subr.bf16.mxu1 %v3640_v3  ;;  %v20_v6 = vld [vmem:[%s4114_s1 + $0x10] sm:$0xff] }
   0x2   :  { %v2664_v2 = vld [vmem:[%s4114_s1 + $0x20] sm:$0xff]  ;;  %v3680_v4 = vpack.c.bf16 %v19_v1, %v18_v0  ;;  %v2665_v5 = vld [vmem:[%s4114_s1 + $0x28] sm:$0xff]  ;;  %v21_v7 = vld [vmem:[%s4114_s1 + $0x18] sm:$0xff]  ;;  %2931 = vmatprep.mubr.msk.f32.mxu0 %vm3641_vm0, %v3642_v11  ;;  %2942 = vmatprep.mubr.msk.f32.mxu1 %vm3641_vm0, %v3642_v11 }
   0x3   :  { %v3691_v8 = vpack.c.bf16 %v2665_v5, %v2664_v2  ;;  %v2666_v9 = vld [vmem:[%s4114_s1 + $0x30] sm:$0xff]  ;;  %v2667_v10 = vld [vmem:[%s4114_s1 + $0x38] sm:$0xff]  ;;  %v3704_v12 = vpack.c.bf16 %v21_v7, %v20_v6  ;;  %v2668_v14 = vld [vmem:[%s4114_s1 + $0x40] sm:$0xff] }
   0x4   :  { %3288 = vmatpush3.bf16.msra.mxu0 %v3680_v4  ;;  %v3708_v13 = vpack.c.bf16 %v2667_v10, %v2666_v9  ;;  %v2669_v15 = vld [vmem:[%s4114_s1 + $0x48] sm:$0xff]  ;;  %v2672_v16 = vld [vmem:[%s4114_s1 + $0x60] sm:$0xff] }
   0x5   :  { %3294 = vmatpush3.bf16.msra.mxu1 %v3691_v8  ;;  %3289 = vmatprep.subr.bf16.mxu0 %v3640_v3  ;;  %v2673_v17 = vld [vmem:[%s4114_s1 + $0x68] sm:$0xff] }
   0x6   :  { %3295 = vmatprep.subr.bf16.mxu1 %v3640_v3 }
   0x7   :  { %9 = vsyncpa [#allocation3], 0  ;;  %v3724_v18 = vpack.c.bf16 %v2669_v15, %v2668_v14  ;;  %v3728_v19 = vpack.c.bf16 %v2673_v17, %v2672_v16  ;;  %v2670_v20 = vld [vmem:[%s4114_s1 + $0x50] sm:$0xff]  ;;  %v2671_v21 = vld [vmem:[%s4114_s1 + $0x58] sm:$0xff]  ;;  %vm41_vm1 = vcmask 261120   ;;  %s3643_s12 = smov [#allocation2]  }
   0x8   :  { %3291 = vmatpush3.bf16.msra.mxu0 %v3704_v12  ;;  %v2674_v22 = vld [vmem:[%s4114_s1 + $0x70] sm:$0xff]  ;;  %v2675_v23 = vld [vmem:[%s4114_s1 + $0x78] sm:$0xff]  ;;  %v3746_v24 = vpack.c.bf16 %v2671_v21, %v2670_v20  ;;  %v37_v26 = vld [vmem:[%s4113_s0] sm:$0x3]  ;;  %s2656_s13 = sshll.u32 %s3643_s12, 4  ;;  %s2657_s13 = int_to_ptr.vmem [resolvable:$true] %s2656_s13 }
   0x9   :  { %3297 = vmatpush3.bf16.msra.mxu1 %v3708_v13  ;;  %3298 = vmatprep.subr.bf16.mxu0 %v3640_v3  ;;  %v3750_v25 = vpack.c.bf16 %v2675_v23, %v2674_v22  ;;  %v38_v27 = vld [vmem:[%s4113_s0 + $0x2] sm:$0x3]  ;;  %v40_v36 = vld [vmem:[%s4113_s0 + $0x6] sm:$0x3]  ;;  %v39_v38 = vld [vmem:[%s4113_s0 + $0x4] sm:$0x3]  ;;  %p3621_p1 = scmp.lt.s32.totalorder %s2657_s13, %s2657_s13 }
   0xa   :  { %3304 = vmatprep.subr.bf16.mxu1 %v3640_v3  ;;  %v2679_v60 = vld [vmem:[%s4113_s0 + $0x8] sm:$0x3]  ;;  %v2680_v61 = vld [vmem:[%s4113_s0 + $0xa] sm:$0x3]  ;;  %v2682_v9 = vld [vmem:[%s4113_s0 + $0xe] sm:$0x3] }
   0xb   :  { %2932 = vmatmul.mubr.f32.vlgmr.msra.gmra.mrb[0].mxu0 %v3642_v11  ;;  %v2681_v20 = vld [vmem:[%s4113_s0 + $0xc] sm:$0x3]  ;;  %s3616_s14 = scalar_lea.vmem %s2657_s13, 32 }
   0xc   :  { %2943 = vmatmul.mubr.f32.vlgmr.msra.gmra.mrb[0].mxu1 %v3642_v11  ;;  %3300 = vmatpush3.bf16.msra.mxu0 %v3724_v18  ;;  %p3617_p0 = scmp.ne.s32.totalorder %s2657_s13, %s3616_s14  ;;  %p3622_p2 = scmp.lt.s32.totalorder %s3616_s14, %s3616_s14 }
   0xd   :  { %3306 = vmatpush3.bf16.msra.mxu1 %v3728_v19  ;;  %3301 = vmatprep.subr.bf16.mxu0 %v3640_v3 }
   0xe   :  { %3307 = vmatprep.subr.bf16.mxu1 %v3640_v3  ;;  %2953 = vmatprep.mubr.msk.f32.mxu0 %vm3641_vm0, %v3642_v11  ;;  %p3623_p3 = por %p3622_p2, %p3621_p1 }
   0xf   :  { %2964 = vmatprep.mubr.msk.f32.mxu1 %vm3641_vm0, %v3642_v11 }
  0x10   :  { %3303 = vmatpush3.bf16.msra.mxu0 %v3746_v24  ;;  %p3624_p4 = pnand %p3623_p3, %p3617_p0 }
  0x11   :  { %3309 = vmatpush3.bf16.msra.mxu1 %v3750_v25  ;;  %3310 = vmatprep.subr.bf16.mxu0 %v3640_v3 }
  0x12   :  { %3316 = vmatprep.subr.bf16.mxu1 %v3640_v3 }
  0x13   :  { %2954 = vmatmul.mubr.f32.vlgmr.msra.gmra.mrb[2].mxu0 %v3642_v11 }
  0x14   :  { %2965 = vmatmul.mubr.f32.vlgmr.msra.gmra.mrb[2].mxu1 %v3642_v11  ;;  %3312 = vmatpush3.bf16.msra.mxu0 %v3680_v4 }
  0x15   :  { %3318 = vmatpush3.bf16.msra.mxu1 %v3691_v8  ;;  %3313 = vmatprep.subr.bf16.mxu0 %v3640_v3 }
  0x16   :  { %3319 = vmatprep.subr.bf16.mxu1 %v3640_v3  ;;  %2975 = vmatprep.mubr.msk.f32.mxu0 %vm3641_vm0, %v3642_v11 }
  0x17   :  { %2986 = vmatprep.mubr.msk.f32.mxu1 %vm3641_vm0, %v3642_v11 }
  0x18   :  { %3315 = vmatpush3.bf16.msra.mxu0 %v3704_v12 }
  0x19   :  { %3321 = vmatpush3.bf16.msra.mxu1 %v3708_v13  ;;  %3322 = vmatprep.subr.bf16.mxu0 %v3640_v3 }
  0x1a   :  { %3328 = vmatprep.subr.bf16.mxu1 %v3640_v3 }
  0xde   :  { %v111_v28 = vpop.f32.mrb[0].mxu0 }
  0xdf   :  { %v115_v29 = vadd.f32 %v111_v28, %v37_v26  ;;  %v182_v30 = vpop.f32.mrb[0].mxu1  ;;  %v2933_v31 = vpop.f32.mrb[1].mxu0 }
  0xe0   :  { %v186_v32 = vadd.f32 %v182_v30, %v38_v27  ;;  %v2944_v33 = vpop.f32.mrb[1].mxu1 }
  0xe1   :  { %v2676_v34 = vmul.f32 -1.442695, %v115_v29 }
  0xe2   :  { %v2677_v35 = vmul.f32 -1.442695, %v186_v32 }
  0xe3   :  { %3488 = vpow2.f32 %v2676_v34 }
  0xe4   :  { %3490 = vpow2.f32 %v2677_v35 }
  0xe6   :  { %v253_v37 = vpop.f32.mrb[2].mxu0 }
  0xe7   :  { %v324_v39 = vpop.f32.mrb[2].mxu1  ;;  %v2955_v40 = vpop.f32.mrb[3].mxu0  ;;  %v257_v43 = vadd.f32 %v253_v37, %v39_v38 }
  0xe8   :  { %v328_v41 = vadd.f32 %v324_v39, %v40_v36  ;;  %v2966_v42 = vpop.f32.mrb[3].mxu1  ;;  %v2690_v40 = vld [vmem:[%s4113_s0 + $0x10] sm:$0x3] }
  0xea   :  { %v2678_v44 = vmul.f32 -1.442695, %v328_v41  ;;  %v2691_v41 = vld [vmem:[%s4113_s0 + $0x12] sm:$0x3] }
  0xec   :  { %3492 = vpow2.f32 %v2678_v44 }
  0xed   :  { %v3489_v45 = vpop.eup %3488  ;;  %3494 = vtanh.f32 %v257_v43 }
  0xee   :  { %v3491_v46 = vpop.eup %3490  ;;  %v332_v47 = vadd.f32 1.0, %v3489_v45 }
  0xef   :  { %v338_v48 = vadd.f32 1.0, %v3491_v46 }
  0xf0   :  { %3496 = vrcp.f32 %v332_v47 }
  0xf1   :  { %3498 = vrcp.f32 %v338_v48 }
  0xf6   :  { %v3493_v49 = vpop.eup %3492 }
  0xf7   :  { %v3495_v50 = vpop.eup %3494  ;;  %v345_v52 = vadd.f32 1.0, %v3493_v49 }
  0xf9   :  { %3500 = vrcp.f32 %v345_v52 }
  0xfa   :  { %v3497_v51 = vpop.eup %3496 }
  0xfb   :  { %v3499_v53 = vpop.eup %3498  ;;  %v349_v54 = vmul.f32 %v3497_v51, %v3495_v50  ;;  %v2693_v50 = vld [vmem:[%s4113_s0 + $0x16] sm:$0x3] }
  0xfc   :  { %v348_v55 = vmul.f32 0.0, %v3499_v53 }
  0xfe   :  { %v3787_v56 = vadd.f32 %v349_v54, %v348_v55 }
 0x100   :  { %3502 = vtanh.f32 %v3787_v56 }
 0x103   :  { %v3501_v57 = vpop.eup %3500 }
 0x10a   :  { %v3503_v58 = vpop.eup %3502 }
 0x10b   :  { %v352_v59 = vmul.f32 %v3503_v58, %v3501_v57 }
 0x10d   :  { %2976 = vmatmul.mubr.msk.f32.vlgmr.msra.gmra.mrb[4].mxu0 %vm41_vm1, %v352_v59  ;;  %2987 = vmatmul.mubr.msk.f32.vlgmr.msra.gmra.mrb[4].mxu1 %vm41_vm1, %v352_v59 }
 0x10e   :  { %3324 = vmatpush3.bf16.msra.mxu0 %v3724_v18  ;;  %3330 = vmatpush3.bf16.msra.mxu1 %v3728_v19 }
 0x10f   :  { %3325 = vmatprep.subr.bf16.mxu0 %v3640_v3  ;;  %3331 = vmatprep.subr.bf16.mxu1 %v3640_v3 }
 0x110   :  { %2997 = vmatprep.mubr.msk.f32.mxu0 %vm3641_vm0, %v3642_v11  ;;  %3008 = vmatprep.mubr.msk.f32.mxu1 %vm3641_vm0, %v3642_v11 }
 0x112   :  { %3327 = vmatpush3.bf16.msra.mxu0 %v3746_v24  ;;  %3333 = vmatpush3.bf16.msra.mxu1 %v3750_v25 }
 0x113   :  { %3334 = vmatprep.subr.bf16.mxu0 %v3640_v3  ;;  %3340 = vmatprep.subr.bf16.mxu1 %v3640_v3 }
 0x115   :  { %2998 = vmatmul.mubr.msk.f32.vlgmr.msra.gmra.mrb[6].mxu0 %vm41_vm1, %v352_v59  ;;  %3009 = vmatmul.mubr.msk.f32.vlgmr.msra.gmra.mrb[6].mxu1 %vm41_vm1, %v352_v59 }
 0x116   :  { %3336 = vmatpush3.bf16.msra.mxu0 %v3680_v4  ;;  %3342 = vmatpush3.bf16.msra.mxu1 %v3691_v8 }
 0x117   :  { %3337 = vmatprep.subr.bf16.mxu0 %v3640_v3  ;;  %3343 = vmatprep.subr.bf16.mxu1 %v3640_v3 }
 0x118   :  { %3019 = vmatprep.mubr.msk.f32.mxu0 %vm3641_vm0, %v3642_v11  ;;  %3030 = vmatprep.mubr.msk.f32.mxu1 %vm3641_vm0, %v3642_v11 }
 0x11a   :  { %3339 = vmatpush3.bf16.msra.mxu0 %v3704_v12  ;;  %3345 = vmatpush3.bf16.msra.mxu1 %v3708_v13 }
 0x11b   :  { %3346 = vmatprep.subr.bf16.mxu0 %v3640_v3  ;;  %3352 = vmatprep.subr.bf16.mxu1 %v3640_v3 }
 0x1e0   :  { %v427_v62 = vpop.f32.mrb[4].mxu0  ;;  %v498_v63 = vpop.f32.mrb[4].mxu1 }
 0x1e1   :  { %v431_v0 = vadd.f32 %v2679_v60, %v427_v62  ;;  %v502_v1 = vadd.f32 %v2680_v61, %v498_v63  ;;  %v2977_v2 = vpop.f32.mrb[5].mxu0  ;;  %v2988_v5 = vpop.f32.mrb[5].mxu1 }
 0x1e3   :  { %v2687_v6 = vmul.f32 -1.442695, %v431_v0  ;;  %v2688_v7 = vmul.f32 -1.442695, %v502_v1 }
 0x1e5   :  { %3504 = vpow2.f32 %v2687_v6 }
 0x1e6   :  { %3506 = vpow2.f32 %v2688_v7 }
 0x1e8   :  { %v569_v10 = vpop.f32.mrb[6].mxu0  ;;  %v640_v14 = vpop.f32.mrb[6].mxu1 }
 0x1e9   :  { %v644_v15 = vadd.f32 %v2682_v9, %v640_v14  ;;  %v2999_v16 = vpop.f32.mrb[7].mxu0  ;;  %v3010_v17 = vpop.f32.mrb[7].mxu1  ;;  %v573_v22 = vadd.f32 %v2681_v20, %v569_v10 }
 0x1ea   :  { %v2701_v16 = vld [vmem:[%s4113_s0 + $0x18] sm:$0x3]  ;;  %v2702_v17 = vld [vmem:[%s4113_s0 + $0x1a] sm:$0x3] }
 0x1eb   :  { %v2689_v21 = vmul.f32 -1.442695, %v644_v15 }
 0x1ed   :  { %3508 = vpow2.f32 %v2689_v21 }
 0x1ee   :  { %3510 = vtanh.f32 %v573_v22 }
 0x1ef   :  { %v3505_v23 = vpop.eup %3504 }
 0x1f0   :  { %v3507_v26 = vpop.eup %3506  ;;  %v648_v27 = vadd.f32 1.0, %v3505_v23 }
 0x1f1   :  { %v654_v28 = vadd.f32 1.0, %v3507_v26 }
 0x1f2   :  { %3512 = vrcp.f32 %v648_v27 }
 0x1f3   :  { %3514 = vrcp.f32 %v654_v28 }
 0x1f7   :  { %v3509_v29 = vpop.eup %3508 }
 0x1f8   :  { %v3511_v30 = vpop.eup %3510  ;;  %v661_v34 = vadd.f32 1.0, %v3509_v29 }
 0x1fa   :  { %3516 = vrcp.f32 %v661_v34 }
 0x1fc   :  { %v3513_v31 = vpop.eup %3512 }
 0x1fd   :  { %v3515_v32 = vpop.eup %3514  ;;  %v665_v33 = vmul.f32 %v3513_v31, %v3511_v30  ;;  %v2704_v30 = vld [vmem:[%s4113_s0 + $0x1e] sm:$0x3] }
 0x1fe   :  { %v664_v35 = vmul.f32 %v3515_v32, %v3787_v56  ;;  %v2692_v56 = vld [vmem:[%s4113_s0 + $0x14] sm:$0x3] }
 0x200   :  { %v3831_v36 = vadd.f32 %v665_v33, %v664_v35 }
 0x202   :  { %3518 = vtanh.f32 %v3831_v36 }
 0x204   :  { %v3517_v37 = vpop.eup %3516 }
 0x20c   :  { %v3519_v38 = vpop.eup %3518 }
 0x20d   :  { %v668_v39 = vmul.f32 %v3519_v38, %v3517_v37 }
 0x20f   :  { %3020 = vmatmul.mubr.msk.f32.vlgmr.msra.gmra.mrb[8].mxu0 %vm41_vm1, %v668_v39  ;;  %3031 = vmatmul.mubr.msk.f32.vlgmr.msra.gmra.mrb[8].mxu1 %vm41_vm1, %v668_v39 }
 0x210   :  { %3348 = vmatpush3.bf16.msra.mxu0 %v3724_v18  ;;  %3354 = vmatpush3.bf16.msra.mxu1 %v3728_v19 }
 0x211   :  { %3349 = vmatprep.subr.bf16.mxu0 %v3640_v3  ;;  %3355 = vmatprep.subr.bf16.mxu1 %v3640_v3 }
 0x212   :  { %3041 = vmatprep.mubr.msk.f32.mxu0 %vm3641_vm0, %v3642_v11  ;;  %3052 = vmatprep.mubr.msk.f32.mxu1 %vm3641_vm0, %v3642_v11 }
 0x214   :  { %3351 = vmatpush3.bf16.msra.mxu0 %v3746_v24  ;;  %3357 = vmatpush3.bf16.msra.mxu1 %v3750_v25 }
 0x215   :  { %3358 = vmatprep.subr.bf16.mxu0 %v3640_v3  ;;  %3364 = vmatprep.subr.bf16.mxu1 %v3640_v3 }
 0x217   :  { %3042 = vmatmul.mubr.msk.f32.vlgmr.msra.gmra.mrb[10].mxu0 %vm41_vm1, %v668_v39  ;;  %3053 = vmatmul.mubr.msk.f32.vlgmr.msra.gmra.mrb[10].mxu1 %vm41_vm1, %v668_v39 }
 0x218   :  { %3360 = vmatpush3.bf16.msra.mxu0 %v3680_v4  ;;  %3366 = vmatpush3.bf16.msra.mxu1 %v3691_v8 }
 0x219   :  { %3361 = vmatprep.subr.bf16.mxu0 %v3640_v3  ;;  %3367 = vmatprep.subr.bf16.mxu1 %v3640_v3 }
 0x21a   :  { %3063 = vmatprep.mubr.msk.f32.mxu0 %vm3641_vm0, %v3642_v11  ;;  %3074 = vmatprep.mubr.msk.f32.mxu1 %vm3641_vm0, %v3642_v11 }
 0x21c   :  { %3363 = vmatpush3.bf16.msra.mxu0 %v3704_v12  ;;  %3369 = vmatpush3.bf16.msra.mxu1 %v3708_v13 }
 0x21d   :  { %3370 = vmatprep.subr.bf16.mxu0 %v3640_v3  ;;  %3376 = vmatprep.subr.bf16.mxu1 %v3640_v3 }
 0x2e2   :  { %v743_v42 = vpop.f32.mrb[8].mxu0  ;;  %v814_v43 = vpop.f32.mrb[8].mxu1 }
 0x2e3   :  { %v747_v44 = vadd.f32 %v2690_v40, %v743_v42  ;;  %v818_v45 = vadd.f32 %v2691_v41, %v814_v43  ;;  %v3021_v46 = vpop.f32.mrb[9].mxu0  ;;  %v3032_v47 = vpop.f32.mrb[9].mxu1 }
 0x2e5   :  { %v2698_v48 = vmul.f32 -1.442695, %v747_v44  ;;  %v2699_v49 = vmul.f32 -1.442695, %v818_v45 }
 0x2e7   :  { %3520 = vpow2.f32 %v2698_v48 }
 0x2e8   :  { %3522 = vpow2.f32 %v2699_v49 }
 0x2ea   :  { %v885_v51 = vpop.f32.mrb[10].mxu0  ;;  %v956_v52 = vpop.f32.mrb[10].mxu1 }
 0x2eb   :  { %v960_v53 = vadd.f32 %v2693_v50, %v956_v52  ;;  %v3043_v54 = vpop.f32.mrb[11].mxu0  ;;  %v3054_v55 = vpop.f32.mrb[11].mxu1  ;;  %v889_v58 = vadd.f32 %v2692_v56, %v885_v51 }
 0x2ec   :  { %v2712_v54 = vld [vmem:[%s4113_s0 + $0x20] sm:$0x3]  ;;  %v2713_v55 = vld [vmem:[%s4113_s0 + $0x22] sm:$0x3] }
 0x2ed   :  { %v2700_v57 = vmul.f32 -1.442695, %v960_v53 }
 0x2ef   :  { %3524 = vpow2.f32 %v2700_v57 }
 0x2f0   :  { %3526 = vtanh.f32 %v889_v58 }
 0x2f1   :  { %v3521_v59 = vpop.eup %3520 }
 0x2f2   :  { %v3523_v60 = vpop.eup %3522  ;;  %v964_v61 = vadd.f32 1.0, %v3521_v59 }
 0x2f3   :  { %v970_v62 = vadd.f32 1.0, %v3523_v60 }
 0x2f4   :  { %3528 = vrcp.f32 %v964_v61 }
 0x2f5   :  { %3530 = vrcp.f32 %v970_v62 }
 0x2f9   :  { %v3525_v63 = vpop.eup %3524 }
 0x2fa   :  { %v3527_v0 = vpop.eup %3526  ;;  %v977_v6 = vadd.f32 1.0, %v3525_v63 }
 0x2fc   :  { %3532 = vrcp.f32 %v977_v6 }
 0x2fe   :  { %v3529_v1 = vpop.eup %3528 }
 0x2ff   :  { %v3531_v2 = vpop.eup %3530  ;;  %v981_v5 = vmul.f32 %v3529_v1, %v3527_v0  ;;  %v2715_v0 = vld [vmem:[%s4113_s0 + $0x26] sm:$0x3] }
 0x300   :  { %v980_v7 = vmul.f32 %v3531_v2, %v3831_v36  ;;  %v2703_v36 = vld [vmem:[%s4113_s0 + $0x1c] sm:$0x3] }
 0x302   :  { %v3875_v9 = vadd.f32 %v981_v5, %v980_v7 }
 0x304   :  { %3534 = vtanh.f32 %v3875_v9 }
 0x306   :  { %v3533_v10 = vpop.eup %3532 }
 0x30e   :  { %v3535_v14 = vpop.eup %3534 }
 0x30f   :  { %v984_v15 = vmul.f32 %v3535_v14, %v3533_v10 }
 0x311   :  { %3064 = vmatmul.mubr.msk.f32.vlgmr.msra.gmra.mrb[12].mxu0 %vm41_vm1, %v984_v15  ;;  %3075 = vmatmul.mubr.msk.f32.vlgmr.msra.gmra.mrb[12].mxu1 %vm41_vm1, %v984_v15 }
 0x312   :  { %3372 = vmatpush3.bf16.msra.mxu0 %v3724_v18  ;;  %3378 = vmatpush3.bf16.msra.mxu1 %v3728_v19 }
 0x313   :  { %3373 = vmatprep.subr.bf16.mxu0 %v3640_v3  ;;  %3379 = vmatprep.subr.bf16.mxu1 %v3640_v3 }
 0x314   :  { %3085 = vmatprep.mubr.msk.f32.mxu0 %vm3641_vm0, %v3642_v11  ;;  %3096 = vmatprep.mubr.msk.f32.mxu1 %vm3641_vm0, %v3642_v11 }
 0x316   :  { %3375 = vmatpush3.bf16.msra.mxu0 %v3746_v24  ;;  %3381 = vmatpush3.bf16.msra.mxu1 %v3750_v25 }
 0x317   :  { %3382 = vmatprep.subr.bf16.mxu0 %v3640_v3  ;;  %3388 = vmatprep.subr.bf16.mxu1 %v3640_v3 }
 0x319   :  { %3086 = vmatmul.mubr.msk.f32.vlgmr.msra.gmra.mrb[14].mxu0 %vm41_vm1, %v984_v15  ;;  %3097 = vmatmul.mubr.msk.f32.vlgmr.msra.gmra.mrb[14].mxu1 %vm41_vm1, %v984_v15 }
 0x31a   :  { %3384 = vmatpush3.bf16.msra.mxu0 %v3680_v4  ;;  %3390 = vmatpush3.bf16.msra.mxu1 %v3691_v8 }
 0x31b   :  { %3385 = vmatprep.subr.bf16.mxu0 %v3640_v3  ;;  %3391 = vmatprep.subr.bf16.mxu1 %v3640_v3 }
 0x31c   :  { %3107 = vmatprep.mubr.msk.f32.mxu0 %vm3641_vm0, %v3642_v11  ;;  %3118 = vmatprep.mubr.msk.f32.mxu1 %vm3641_vm0, %v3642_v11 }
 0x31e   :  { %3387 = vmatpush3.bf16.msra.mxu0 %v3704_v12  ;;  %3393 = vmatpush3.bf16.msra.mxu1 %v3708_v13 }
 0x31f   :  { %3394 = vmatprep.subr.bf16.mxu0 %v3640_v3  ;;  %3400 = vmatprep.subr.bf16.mxu1 %v3640_v3 }
 0x3e4   :  { %v1059_v20 = vpop.f32.mrb[12].mxu0  ;;  %v1130_v21 = vpop.f32.mrb[12].mxu1 }
 0x3e5   :  { %v1063_v22 = vadd.f32 %v2701_v16, %v1059_v20  ;;  %v1134_v23 = vadd.f32 %v2702_v17, %v1130_v21  ;;  %v3065_v26 = vpop.f32.mrb[13].mxu0  ;;  %v3076_v27 = vpop.f32.mrb[13].mxu1 }
 0x3e7   :  { %v2709_v28 = vmul.f32 -1.442695, %v1063_v22  ;;  %v2710_v29 = vmul.f32 -1.442695, %v1134_v23 }
 0x3e9   :  { %3536 = vpow2.f32 %v2709_v28 }
 0x3ea   :  { %3538 = vpow2.f32 %v2710_v29 }
 0x3ec   :  { %v1201_v31 = vpop.f32.mrb[14].mxu0  ;;  %v1272_v32 = vpop.f32.mrb[14].mxu1 }
 0x3ed   :  { %v1276_v33 = vadd.f32 %v2704_v30, %v1272_v32  ;;  %v3087_v34 = vpop.f32.mrb[15].mxu0  ;;  %v3098_v35 = vpop.f32.mrb[15].mxu1  ;;  %v1205_v38 = vadd.f32 %v2703_v36, %v1201_v31 }
 0x3ee   :  { %v2723_v34 = vld [vmem:[%s4113_s0 + $0x28] sm:$0x3]  ;;  %v2724_v35 = vld [vmem:[%s4113_s0 + $0x2a] sm:$0x3] }
 0x3ef   :  { %v2711_v37 = vmul.f32 -1.442695, %v1276_v33 }
 0x3f1   :  { %3540 = vpow2.f32 %v2711_v37 }
 0x3f2   :  { %3542 = vtanh.f32 %v1205_v38 }
 0x3f3   :  { %v3537_v39 = vpop.eup %3536 }
 0x3f4   :  { %v3539_v40 = vpop.eup %3538  ;;  %v1280_v41 = vadd.f32 1.0, %v3537_v39 }
 0x3f5   :  { %v1286_v42 = vadd.f32 1.0, %v3539_v40 }
 0x3f6   :  { %3544 = vrcp.f32 %v1280_v41 }
 0x3f7   :  { %3546 = vrcp.f32 %v1286_v42 }
 0x3fb   :  { %v3541_v43 = vpop.eup %3540 }
 0x3fc   :  { %v3543_v44 = vpop.eup %3542  ;;  %v1293_v48 = vadd.f32 1.0, %v3541_v43 }
 0x3fe   :  { %3548 = vrcp.f32 %v1293_v48 }
 0x400   :  { %v3545_v45 = vpop.eup %3544 }
 0x401   :  { %v3547_v46 = vpop.eup %3546  ;;  %v1297_v47 = vmul.f32 %v3545_v45, %v3543_v44  ;;  %v2726_v44 = vld [vmem:[%s4113_s0 + $0x2e] sm:$0x3] }
 0x402   :  { %v1296_v49 = vmul.f32 %v3547_v46, %v3875_v9  ;;  %v2714_v9 = vld [vmem:[%s4113_s0 + $0x24] sm:$0x3] }
 0x404   :  { %v3919_v50 = vadd.f32 %v1297_v47, %v1296_v49 }
 0x406   :  { %3550 = vtanh.f32 %v3919_v50 }
 0x408   :  { %v3549_v51 = vpop.eup %3548 }
 0x410   :  { %v3551_v52 = vpop.eup %3550 }
 0x411   :  { %v1300_v53 = vmul.f32 %v3551_v52, %v3549_v51 }
 0x413   :  { %3108 = vmatmul.mubr.msk.f32.vlgmr.msra.gmra.mrb[16].mxu0 %vm41_vm1, %v1300_v53  ;;  %3119 = vmatmul.mubr.msk.f32.vlgmr.msra.gmra.mrb[16].mxu1 %vm41_vm1, %v1300_v53 }
 0x414   :  { %3396 = vmatpush3.bf16.msra.mxu0 %v3724_v18  ;;  %3402 = vmatpush3.bf16.msra.mxu1 %v3728_v19 }
 0x415   :  { %3397 = vmatprep.subr.bf16.mxu0 %v3640_v3  ;;  %3403 = vmatprep.subr.bf16.mxu1 %v3640_v3 }
 0x416   :  { %3129 = vmatprep.mubr.msk.f32.mxu0 %vm3641_vm0, %v3642_v11  ;;  %3140 = vmatprep.mubr.msk.f32.mxu1 %vm3641_vm0, %v3642_v11 }
 0x418   :  { %3399 = vmatpush3.bf16.msra.mxu0 %v3746_v24  ;;  %3405 = vmatpush3.bf16.msra.mxu1 %v3750_v25 }
 0x419   :  { %3406 = vmatprep.subr.bf16.mxu0 %v3640_v3  ;;  %3412 = vmatprep.subr.bf16.mxu1 %v3640_v3 }
 0x41b   :  { %3130 = vmatmul.mubr.msk.f32.vlgmr.msra.gmra.mrb[18].mxu0 %vm41_vm1, %v1300_v53  ;;  %3141 = vmatmul.mubr.msk.f32.vlgmr.msra.gmra.mrb[18].mxu1 %vm41_vm1, %v1300_v53 }
 0x41c   :  { %3408 = vmatpush3.bf16.msra.mxu0 %v3680_v4  ;;  %3414 = vmatpush3.bf16.msra.mxu1 %v3691_v8 }
 0x41d   :  { %3409 = vmatprep.subr.bf16.mxu0 %v3640_v3  ;;  %3415 = vmatprep.subr.bf16.mxu1 %v3640_v3 }
 0x41e   :  { %3151 = vmatprep.mubr.msk.f32.mxu0 %vm3641_vm0, %v3642_v11  ;;  %3162 = vmatprep.mubr.msk.f32.mxu1 %vm3641_vm0, %v3642_v11 }
 0x420   :  { %3411 = vmatpush3.bf16.msra.mxu0 %v3704_v12  ;;  %3417 = vmatpush3.bf16.msra.mxu1 %v3708_v13 }
 0x421   :  { %3418 = vmatprep.subr.bf16.mxu0 %v3640_v3  ;;  %3424 = vmatprep.subr.bf16.mxu1 %v3640_v3 }
 0x4e6   :  { %v1375_v56 = vpop.f32.mrb[16].mxu0  ;;  %v1446_v57 = vpop.f32.mrb[16].mxu1 }
 0x4e7   :  { %v1379_v58 = vadd.f32 %v2712_v54, %v1375_v56  ;;  %v1450_v59 = vadd.f32 %v2713_v55, %v1446_v57  ;;  %v3109_v60 = vpop.f32.mrb[17].mxu0  ;;  %v3120_v61 = vpop.f32.mrb[17].mxu1 }
 0x4e9   :  { %v2720_v62 = vmul.f32 -1.442695, %v1379_v58  ;;  %v2721_v63 = vmul.f32 -1.442695, %v1450_v59 }
 0x4eb   :  { %3552 = vpow2.f32 %v2720_v62 }
 0x4ec   :  { %3554 = vpow2.f32 %v2721_v63 }
 0x4ee   :  { %v1517_v1 = vpop.f32.mrb[18].mxu0  ;;  %v1588_v2 = vpop.f32.mrb[18].mxu1 }
 0x4ef   :  { %v1592_v5 = vadd.f32 %v2715_v0, %v1588_v2  ;;  %v3131_v6 = vpop.f32.mrb[19].mxu0  ;;  %v3142_v7 = vpop.f32.mrb[19].mxu1  ;;  %v1521_v14 = vadd.f32 %v2714_v9, %v1517_v1 }
 0x4f1   :  { %v2722_v10 = vmul.f32 -1.442695, %v1592_v5 }
 0x4f3   :  { %3556 = vpow2.f32 %v2722_v10 }
 0x4f4   :  { %3558 = vtanh.f32 %v1521_v14 }
 0x4f5   :  { %v3553_v15 = vpop.eup %3552 }
 0x4f6   :  { %v3555_v16 = vpop.eup %3554  ;;  %v1596_v17 = vadd.f32 1.0, %v3553_v15 }
 0x4f7   :  { %v1602_v20 = vadd.f32 1.0, %v3555_v16  ;;  %v2737_v16 = vld [vmem:[%s4113_s0 + $0x36] sm:$0x3] }
 0x4f8   :  { %3560 = vrcp.f32 %v1596_v17 }
 0x4f9   :  { %3562 = vrcp.f32 %v1602_v20 }
 0x4fd   :  { %v3557_v21 = vpop.eup %3556 }
 0x4fe   :  { %v3559_v22 = vpop.eup %3558  ;;  %v1609_v28 = vadd.f32 1.0, %v3557_v21 }
 0x500   :  { %3564 = vrcp.f32 %v1609_v28 }
 0x502   :  { %v3561_v23 = vpop.eup %3560 }
 0x503   :  { %v3563_v26 = vpop.eup %3562  ;;  %v1613_v27 = vmul.f32 %v3561_v23, %v3559_v22 }
 0x504   :  { %v1612_v29 = vmul.f32 %v3563_v26, %v3919_v50  ;;  %v2725_v50 = vld [vmem:[%s4113_s0 + $0x2c] sm:$0x3]  ;;  %v2736_v26 = vld [vmem:[%s4113_s0 + $0x34] sm:$0x3] }
 0x506   :  { %v3963_v30 = vadd.f32 %v1613_v27, %v1612_v29 }
 0x508   :  { %3566 = vtanh.f32 %v3963_v30 }
 0x50a   :  { %v3565_v31 = vpop.eup %3564 }
 0x512   :  { %v3567_v32 = vpop.eup %3566 }
 0x513   :  { %v1616_v33 = vmul.f32 %v3567_v32, %v3565_v31 }
 0x515   :  { %3152 = vmatmul.mubr.msk.f32.vlgmr.msra.gmra.mrb[20].mxu0 %vm41_vm1, %v1616_v33  ;;  %3163 = vmatmul.mubr.msk.f32.vlgmr.msra.gmra.mrb[20].mxu1 %vm41_vm1, %v1616_v33 }
 0x516   :  { %3420 = vmatpush3.bf16.msra.mxu0 %v3724_v18  ;;  %3426 = vmatpush3.bf16.msra.mxu1 %v3728_v19 }
 0x517   :  { %3421 = vmatprep.subr.bf16.mxu0 %v3640_v3  ;;  %3427 = vmatprep.subr.bf16.mxu1 %v3640_v3 }
 0x518   :  { %3173 = vmatprep.mubr.msk.f32.mxu0 %vm3641_vm0, %v3642_v11  ;;  %3184 = vmatprep.mubr.msk.f32.mxu1 %vm3641_vm0, %v3642_v11 }
 0x51a   :  { %3423 = vmatpush3.bf16.msra.mxu0 %v3746_v24  ;;  %3429 = vmatpush3.bf16.msra.mxu1 %v3750_v25 }
 0x51b   :  { %3430 = vmatprep.subr.bf16.mxu0 %v3640_v3  ;;  %3436 = vmatprep.subr.bf16.mxu1 %v3640_v3 }
 0x51d   :  { %3174 = vmatmul.mubr.msk.f32.vlgmr.msra.gmra.mrb[22].mxu0 %vm41_vm1, %v1616_v33  ;;  %3185 = vmatmul.mubr.msk.f32.vlgmr.msra.gmra.mrb[22].mxu1 %vm41_vm1, %v1616_v33 }
 0x51e   :  { %3432 = vmatpush3.bf16.msra.mxu0 %v3680_v4  ;;  %3438 = vmatpush3.bf16.msra.mxu1 %v3691_v8 }
 0x51f   :  { %3433 = vmatprep.subr.bf16.mxu0 %v3640_v3  ;;  %3439 = vmatprep.subr.bf16.mxu1 %v3640_v3 }
 0x520   :  { %3195 = vmatprep.mubr.msk.f32.mxu0 %vm3641_vm0, %v3642_v11  ;;  %3206 = vmatprep.mubr.msk.f32.mxu1 %vm3641_vm0, %v3642_v11 }
 0x522   :  { %3435 = vmatpush3.bf16.msra.mxu0 %v3704_v12  ;;  %3441 = vmatpush3.bf16.msra.mxu1 %v3708_v13 }
 0x523   :  { %3442 = vmatprep.subr.bf16.mxu0 %v3640_v3  ;;  %3448 = vmatprep.subr.bf16.mxu1 %v3640_v3 }
 0x5e8   :  { %v1691_v36 = vpop.f32.mrb[20].mxu0  ;;  %v1762_v37 = vpop.f32.mrb[20].mxu1 }
 0x5e9   :  { %v1695_v38 = vadd.f32 %v2723_v34, %v1691_v36  ;;  %v1766_v39 = vadd.f32 %v2724_v35, %v1762_v37  ;;  %v3153_v40 = vpop.f32.mrb[21].mxu0  ;;  %v3164_v41 = vpop.f32.mrb[21].mxu1 }
 0x5eb   :  { %v2731_v42 = vmul.f32 -1.442695, %v1695_v38  ;;  %v2732_v43 = vmul.f32 -1.442695, %v1766_v39 }
 0x5ed   :  { %3568 = vpow2.f32 %v2731_v42 }
 0x5ee   :  { %3570 = vpow2.f32 %v2732_v43 }
 0x5f0   :  { %v1833_v45 = vpop.f32.mrb[22].mxu0  ;;  %v1904_v46 = vpop.f32.mrb[22].mxu1 }
 0x5f1   :  { %v1908_v47 = vadd.f32 %v2726_v44, %v1904_v46  ;;  %v3175_v48 = vpop.f32.mrb[23].mxu0  ;;  %v3186_v49 = vpop.f32.mrb[23].mxu1  ;;  %v1837_v52 = vadd.f32 %v2725_v50, %v1833_v45  ;;  %v2568_v44 = vld [vmem:[%s4115_s2 + $0x18] sm:$0xff] }
 0x5f2   :  { %v2746_v46 = vld [vmem:[%s4113_s0 + $0x3a] sm:$0x3] }
 0x5f3   :  { %v2733_v51 = vmul.f32 -1.442695, %v1908_v47 }
 0x5f5   :  { %3572 = vpow2.f32 %v2733_v51 }
 0x5f6   :  { %3574 = vtanh.f32 %v1837_v52 }
 0x5f7   :  { %v3569_v53 = vpop.eup %3568 }
 0x5f8   :  { %v3571_v54 = vpop.eup %3570  ;;  %v1912_v55 = vadd.f32 1.0, %v3569_v53 }
 0x5f9   :  { %v1918_v56 = vadd.f32 1.0, %v3571_v54 }
 0x5fa   :  { %3576 = vrcp.f32 %v1912_v55 }
 0x5fb   :  { %3578 = vrcp.f32 %v1918_v56 }
 0x5ff   :  { %v3573_v57 = vpop.eup %3572 }
 0x600   :  { %v3575_v58 = vpop.eup %3574  ;;  %v1925_v62 = vadd.f32 1.0, %v3573_v57 }
 0x602   :  { %3580 = vrcp.f32 %v1925_v62 }
 0x604   :  { %v3577_v59 = vpop.eup %3576 }
 0x605   :  { %v3579_v60 = vpop.eup %3578  ;;  %v1929_v61 = vmul.f32 %v3577_v59, %v3575_v58 }
 0x606   :  { %v1928_v63 = vmul.f32 %v3579_v60, %v3963_v30  ;;  %v2747_v60 = vld [vmem:[%s4113_s0 + $0x3c] sm:$0x3] }
 0x608   :  { %v4007_v0 = vadd.f32 %v1929_v61, %v1928_v63 }
 0x60a   :  { %3582 = vtanh.f32 %v4007_v0 }
 0x60c   :  { %v3581_v1 = vpop.eup %3580 }
 0x614   :  { %v3583_v2 = vpop.eup %3582 }
 0x615   :  { %v1932_v5 = vmul.f32 %v3583_v2, %v3581_v1 }
 0x617   :  { %3196 = vmatmul.mubr.msk.f32.vlgmr.msra.gmra.mrb[24].mxu0 %vm41_vm1, %v1932_v5  ;;  %3207 = vmatmul.mubr.msk.f32.vlgmr.msra.gmra.mrb[24].mxu1 %vm41_vm1, %v1932_v5 }
 0x618   :  { %3444 = vmatpush3.bf16.msra.mxu0 %v3724_v18  ;;  %3450 = vmatpush3.bf16.msra.mxu1 %v3728_v19 }
 0x619   :  { %3445 = vmatprep.subr.bf16.mxu0 %v3640_v3  ;;  %3451 = vmatprep.subr.bf16.mxu1 %v3640_v3 }
 0x61a   :  { %3217 = vmatprep.mubr.msk.f32.mxu0 %vm3641_vm0, %v3642_v11  ;;  %3228 = vmatprep.mubr.msk.f32.mxu1 %vm3641_vm0, %v3642_v11 }
 0x61c   :  { %3447 = vmatpush3.bf16.msra.mxu0 %v3746_v24  ;;  %3453 = vmatpush3.bf16.msra.mxu1 %v3750_v25 }
 0x61d   :  { %3454 = vmatprep.subr.bf16.mxu0 %v3640_v3  ;;  %3460 = vmatprep.subr.bf16.mxu1 %v3640_v3 }
 0x61f   :  { %3218 = vmatmul.mubr.msk.f32.vlgmr.msra.gmra.mrb[26].mxu0 %vm41_vm1, %v1932_v5  ;;  %3229 = vmatmul.mubr.msk.f32.vlgmr.msra.gmra.mrb[26].mxu1 %vm41_vm1, %v1932_v5 }
 0x620   :  { %3456 = vmatpush3.bf16.msra.mxu0 %v3680_v4  ;;  %3462 = vmatpush3.bf16.msra.mxu1 %v3691_v8  ;;  %v2734_v4 = vld [vmem:[%s4113_s0 + $0x30] sm:$0x3]  ;;  %v2735_v8 = vld [vmem:[%s4113_s0 + $0x32] sm:$0x3] }
 0x621   :  { %3457 = vmatprep.subr.bf16.mxu0 %v3640_v3  ;;  %3463 = vmatprep.subr.bf16.mxu1 %v3640_v3 }
 0x622   :  { %3239 = vmatprep.mubr.msk.f32.mxu0 %vm3641_vm0, %v3642_v11  ;;  %3250 = vmatprep.mubr.msk.f32.mxu1 %vm3641_vm0, %v3642_v11 }
 0x624   :  { %3459 = vmatpush3.bf16.msra.mxu0 %v3704_v12  ;;  %3465 = vmatpush3.bf16.msra.mxu1 %v3708_v13 }
 0x625   :  { %3466 = vmatprep.subr.bf16.mxu0 %v3640_v3  ;;  %3472 = vmatprep.subr.bf16.mxu1 %v3640_v3 }
 0x6ea   :  { %v2007_v6 = vpop.f32.mrb[24].mxu0  ;;  %v2078_v7 = vpop.f32.mrb[24].mxu1 }
 0x6eb   :  { %v2011_v9 = vadd.f32 %v2734_v4, %v2007_v6  ;;  %v2082_v10 = vadd.f32 %v2735_v8, %v2078_v7  ;;  %v3197_v14 = vpop.f32.mrb[25].mxu0  ;;  %v3208_v12 = vpop.f32.mrb[25].mxu1 }
 0x6ed   :  { %v2742_v15 = vmul.f32 -1.442695, %v2011_v9  ;;  %v2743_v13 = vmul.f32 -1.442695, %v2082_v10 }
 0x6ef   :  { %3584 = vpow2.f32 %v2742_v15 }
 0x6f0   :  { %3586 = vpow2.f32 %v2743_v13 }
 0x6f2   :  { %v2149_v17 = vpop.f32.mrb[26].mxu0  ;;  %v2220_v20 = vpop.f32.mrb[26].mxu1 }
 0x6f3   :  { %v2224_v21 = vadd.f32 %v2737_v16, %v2220_v20  ;;  %v3219_v22 = vpop.f32.mrb[27].mxu0  ;;  %v3230_v23 = vpop.f32.mrb[27].mxu1  ;;  %v2153_v28 = vadd.f32 %v2736_v26, %v2149_v17  ;;  %v2756_v16 = vld [vmem:[%s4116_s3] ss:$0 sm:$0xff] }
 0x6f5   :  { %v2744_v27 = vmul.f32 -1.442695, %v2224_v21 }
 0x6f7   :  { %3588 = vpow2.f32 %v2744_v27 }
 0x6f8   :  { %3590 = vtanh.f32 %v2153_v28 }
 0x6f9   :  { %v3585_v29 = vpop.eup %3584 }
 0x6fa   :  { %v3587_v30 = vpop.eup %3586  ;;  %v2228_v31 = vadd.f32 1.0, %v3585_v29 }
 0x6fb   :  { %v2234_v32 = vadd.f32 1.0, %v3587_v30 }
 0x6fc   :  { %3592 = vrcp.f32 %v2228_v31 }
 0x6fd   :  { %3594 = vrcp.f32 %v2234_v32 }
 0x701   :  { %v3589_v33 = vpop.eup %3588 }
 0x702   :  { %v3591_v34 = vpop.eup %3590  ;;  %v2241_v38 = vadd.f32 1.0, %v3589_v33 }
 0x704   :  { %3596 = vrcp.f32 %v2241_v38 }
 0x706   :  { %v3593_v35 = vpop.eup %3592 }
 0x707   :  { %v3595_v36 = vpop.eup %3594  ;;  %v2245_v37 = vmul.f32 %v3593_v35, %v3591_v34 }
 0x708   :  { %v2244_v39 = vmul.f32 %v3595_v36, %v4007_v0 }
 0x70a   :  { %v4051_v40 = vadd.f32 %v2245_v37, %v2244_v39 }
 0x70c   :  { %3598 = vtanh.f32 %v4051_v40 }
 0x70e   :  { %v3597_v41 = vpop.eup %3596 }
 0x716   :  { %v3599_v42 = vpop.eup %3598 }
 0x717   :  { %v2248_v43 = vmul.f32 %v3599_v42, %v3597_v41 }
 0x719   :  { %3240 = vmatmul.mubr.msk.f32.vlgmr.msra.gmra.mrb[28].mxu0 %vm41_vm1, %v2248_v43  ;;  %3251 = vmatmul.mubr.msk.f32.vlgmr.msra.gmra.mrb[28].mxu1 %vm41_vm1, %v2248_v43 }
 0x71a   :  { %3468 = vmatpush3.bf16.msra.mxu0 %v3724_v18  ;;  %3474 = vmatpush3.bf16.msra.mxu1 %v3728_v19  ;;  %v2565_v18 = vld [vmem:[%s4115_s2] sm:$0xff]  ;;  %v2566_v19 = vld [vmem:[%s4115_s2 + $0x8] sm:$0xff] }
 0x71b   :  { %3469 = vmatprep.subr.bf16.mxu0 %v3640_v3  ;;  %3475 = vmatprep.subr.bf16.mxu1 %v3640_v3 }
 0x71c   :  { %3261 = vmatprep.mubr.msk.f32.mxu0 %vm3641_vm0, %v3642_v11  ;;  %3272 = vmatprep.mubr.msk.f32.mxu1 %vm3641_vm0, %v3642_v11 }
 0x71e   :  { %3471 = vmatpush3.bf16.msra.mxu0 %v3746_v24  ;;  %3477 = vmatpush3.bf16.msra.mxu1 %v3750_v25  ;;  %v2567_v24 = vld [vmem:[%s4115_s2 + $0x10] sm:$0xff]  ;;  %v3479_v25 = vpack.c.bf16 %v2566_v19, %v2565_v18 }
 0x71f   :  { %3478 = vmatprep.subr.bf16.mxu0 %v3640_v3  ;;  %v3482_v45 = vpack.c.bf16 %v2568_v44, %v2567_v24 }
 0x721   :  { %3262 = vmatmul.mubr.msk.f32.vlgmr.msra.gmra.mrb[30].mxu0 %vm41_vm1, %v2248_v43  ;;  %3273 = vmatmul.mubr.msk.f32.vlgmr.msra.gmra.mrb[30].mxu1 %vm41_vm1, %v2248_v43 }
 0x722   :  { %3283 = vmatprep.mubr.msk.f32.mxu0 %vm3641_vm0, %v3642_v11  ;;  %3480 = vmatpush3.bf16.msra.mxu0 %v3479_v25  ;;  %v2745_v11 = vld [vmem:[%s4113_s0 + $0x38] sm:$0x3] }
 0x723   :  { %3481 = vmatprep.subr.bf16.mxu0 %v3640_v3  ;;  %v2748_v3 = vld [vmem:[%s4113_s0 + $0x3e] sm:$0x3] }
 0x726   :  { %3483 = vmatpush3.bf16.msra.mxu0 %v3482_v45 }
 0x7ec   :  { %v2323_v47 = vpop.f32.mrb[28].mxu0  ;;  %v2394_v48 = vpop.f32.mrb[28].mxu1 }
 0x7ed   :  { %v2327_v49 = vadd.f32 %v2745_v11, %v2323_v47  ;;  %v2398_v50 = vadd.f32 %v2746_v46, %v2394_v48  ;;  %v3241_v51 = vpop.f32.mrb[29].mxu0  ;;  %v3252_v52 = vpop.f32.mrb[29].mxu1 }
 0x7ef   :  { %v2753_v53 = vmul.f32 -1.442695, %v2327_v49  ;;  %v2754_v54 = vmul.f32 -1.442695, %v2398_v50 }
 0x7f1   :  { %3600 = vpow2.f32 %v2753_v53 }
 0x7f2   :  { %3602 = vpow2.f32 %v2754_v54 }
 0x7f4   :  { %v2465_v55 = vpop.f32.mrb[30].mxu0  ;;  %v2536_v56 = vpop.f32.mrb[30].mxu1 }
 0x7f5   :  { %v2540_v57 = vadd.f32 %v2748_v3, %v2536_v56  ;;  %v3263_v58 = vpop.f32.mrb[31].mxu0  ;;  %v3274_v59 = vpop.f32.mrb[31].mxu1  ;;  %v2469_v62 = vadd.f32 %v2747_v60, %v2465_v55 }
 0x7f7   :  { %v2755_v61 = vmul.f32 -1.442695, %v2540_v57 }
 0x7f9   :  { %3604 = vpow2.f32 %v2755_v61 }
 0x7fa   :  { %3606 = vtanh.f32 %v2469_v62 }
 0x7fb   :  { %v3601_v63 = vpop.eup %3600 }
 0x7fc   :  { %v3603_v0 = vpop.eup %3602  ;;  %v2544_v1 = vadd.f32 1.0, %v3601_v63 }
 0x7fd   :  { %v2550_v2 = vadd.f32 1.0, %v3603_v0 }
 0x7fe   :  { %3608 = vrcp.f32 %v2544_v1 }
 0x7ff   :  { %3610 = vrcp.f32 %v2550_v2 }
 0x803   :  { %v3605_v5 = vpop.eup %3604 }
 0x804   :  { %v3607_v4 = vpop.eup %3606  ;;  %v2557_v9 = vadd.f32 1.0, %v3605_v5 }
 0x806   :  { %3612 = vrcp.f32 %v2557_v9 }
 0x808   :  { %v3609_v8 = vpop.eup %3608 }
 0x809   :  { %v3611_v6 = vpop.eup %3610  ;;  %v2561_v7 = vmul.f32 %v3609_v8, %v3607_v4 }
 0x80a   :  { %v2560_v10 = vmul.f32 %v3611_v6, %v4051_v40 }
 0x80c   :  { %v2562_v14 = vadd.f32 %v2561_v7, %v2560_v10 }
 0x80e   :  { %3614 = vtanh.f32 %v2562_v14 }
 0x810   :  { %v3613_v12 = vpop.eup %3612 }
 0x818   :  { %v3615_v15 = vpop.eup %3614 }
 0x819   :  { %v2564_v13 = vmul.f32 %v3615_v15, %v3613_v12 }
 0x81b   :  { %3284 = vmatmul.mubr.msk.f32.vlgmr.msra.gmra.mrb[32].mxu0 %vm41_vm1, %v2564_v13 }
 0x8ee   :  { %v2645_v17 = vpop.f32.mrb[32].mxu0 }
 0x8ef   :  { %v2646_v20 = vadd.f32 %v2756_v16, %v2645_v17  ;;  %v3285_v21 = vpop.f32.mrb[33].mxu0 }
 0x8f1   :  { %2649 = vst [vmem:[#allocation2] sm:$0x3] %v2646_v20 }
 0x8f2   :  { %3627 = shalt.err (!%p3624_p4)
}
 0x8f3   :  { %s3628_s17 = scalar_lea.hbm %s4117_s4, 32 }
 0x8f4   :  { %p3629_p5 = scmp.ne.s32.totalorder %s4117_s4, %s3628_s17  ;;  %p3632_p6 = scmp.lt.u32.totalorder %s3628_s17, %s4117_s4 }
 0x8f6   :  { %p3634_p7 = pnand %p3632_p6, %p3629_p5 }
 0x8f8   :  { %3637 = shalt.err (!%p3634_p7)
}
 0x8f9   :  { %2659 = dma.vmem_to_hbm [thread:$0]  %s2657_s13, 32, %s4117_s4, [#allocation3]  }
 0x8fa   :  { %3638 = dma.done.wait [#allocation3], 32  }
 0x8fb   :  { %3639 = vsyncadd [#allocation3], 4294967264 }
 0x8fc   :  { %2663 = vsyncpa [#allocation3], 1 }

</bundles_post_ra>
